<compile_context>
chip_gen: v6e
topology: v6e:2x2x1
jax: 0.10.0
libtpu: 0.0.40
codegen_flags: <defaults>
</compile_context>

<pallas_src>
import functools

import jax
import jax.numpy as jnp
from jax.experimental import pallas as pl
from jax.experimental.pallas import tpu as pltpu

OUT_SIZE = 299                           # Inception preprocessing target resolution
NUM_CLASSES = 1000                       # Inception-v3 logit width
LANE = 128
SUBLANE = 8
VMEM_BLOCK_BUDGET = 24 * 1024 * 1024     # per-step block budget (safe on v7x 64 MiB/TC)
VMEM_LIMIT_BYTES = 48 * 1024 * 1024      # explicit scoped-VMEM limit (headroom on v7x)


def _round_up(x: int, m: int) -> int:
    return (x + m - 1) // m * m


def bilinear_matrix(in_size: int, out_size: int) -> jnp.ndarray:
    """(out_size, in_size) interpolation matrix matching torch bilinear upsampling
    (align_corners=False) along one axis."""
    scale = in_size / out_size
    dst = jnp.arange(out_size, dtype=jnp.float32)
    src = jnp.maximum((dst + 0.5) * scale - 0.5, 0.0)
    i0 = jnp.clip(jnp.floor(src).astype(jnp.int32), 0, in_size - 1)
    i1 = jnp.minimum(i0 + 1, in_size - 1)
    w1 = src - i0.astype(jnp.float32)
    w0 = 1.0 - w1
    a = jnp.zeros((out_size, in_size), jnp.float32)
    rows = jnp.arange(out_size)
    a = a.at[rows, i0].add(w0)
    a = a.at[rows, i1].add(w1)
    return a


def _pick_block_rows(batch: int, chw: int, itemsize: int) -> int:
    """Images per grid step: biggest multiple of 8 keeping the double-buffered input
    block plus the wide f32 intermediates inside the VMEM budget, while keeping the
    grid >= 2 steps (v7x megacore) whenever the batch allows it."""
    if batch <= SUBLANE:
        return batch                                    # block == full batch dim (legal)
    ncp = _round_up(NUM_CLASSES, LANE)
    per_image = 2 * chw * itemsize + 4 * ncp * 4        # 2x input row + logits/e/ez/z
    weight_bytes = 2 * chw * ncp * 4                    # resident folded weight
    budget = max(VMEM_BLOCK_BUDGET - weight_bytes, SUBLANE * per_image)
    p = (budget // per_image) // SUBLANE * SUBLANE
    p = int(max(SUBLANE, min(256, p)))
    half = _round_up(-(-batch // 2), SUBLANE)           # keep >= 2 grid steps
    return int(min(p, half))


# -------- fused kernel: (pool+head) MXU matmul -> softmax-entropy -> partial sum ---- #
def _entropy_kernel(x_ref, w_ref, b_ref, out_ref, *, batch: int):
    p = x_ref.shape[0]
    # Exact bilinear-GAP + linear head: one MXU matmul against the folded weight.
    logits = jnp.dot(x_ref[...], w_ref[...],
                     preferred_element_type=jnp.float32) + b_ref[...]    # (p, ncp)

    # Per-image entropy via log-sum-exp (padded class lanes give exp(.) == 0):
    #   H = log(sum e^z) - sum(e^z * z) / sum(e^z),   z = logits - max
    m = jnp.max(logits, axis=1, keepdims=True)                           # (p, 1)
    z = logits - m
    e = jnp.exp(z)
    se = jnp.sum(e, axis=1, keepdims=True)                               # (p, 1)
    sez = jnp.sum(e * z, axis=1, keepdims=True)                          # (p, 1)
    ent = jnp.log(se) - sez * pl.reciprocal(se, approx=True)             # (p, 1)

    # Mask tail rows of a partial final block (no wrapper-side jnp.pad copy).
    row = pl.program_id(0) * p + jax.lax.broadcasted_iota(jnp.int32, (p, 1), 0)
    ent = jnp.where(row < batch, ent, 0.0)

    s = jnp.sum(ent, axis=0, keepdims=True)                              # (1, 1)
    out_ref[...] = jnp.broadcast_to(s[:, :, None], out_ref.shape)        # lane-dense store


def _fused_entropy(x_flat, w_fold, bias, *, batch: int, block_rows: int):
    chw = x_flat.shape[1]
    ncp = w_fold.shape[1]
    grid_n = pl.cdiv(batch, block_rows)
    cost = pl.CostEstimate(
        flops=2 * batch * chw * ncp + 8 * batch * ncp,
        transcendentals=batch * (ncp + 2),
        bytes_accessed=(batch * chw * x_flat.dtype.itemsize
                        + chw * ncp * 4 + ncp * 4 + grid_n * SUBLANE * LANE * 4),
    )
    return pl.pallas_call(
        functools.partial(_entropy_kernel, batch=batch),
        out_shape=jax.ShapeDtypeStruct((grid_n, SUBLANE, LANE), jnp.float32),
        grid=(grid_n,),
        in_specs=[
            pl.BlockSpec((block_rows, chw), lambda i: (i, 0)),
            pl.BlockSpec((chw, ncp), lambda i: (0, 0)),      # resident folded weight
            pl.BlockSpec((1, ncp), lambda i: (0, 0)),        # resident bias
        ],
        out_specs=pl.BlockSpec((1, SUBLANE, LANE), lambda i: (i, 0, 0)),
        compiler_params=pltpu.CompilerParams(
            dimension_semantics=("parallel",),
            vmem_limit_bytes=VMEM_LIMIT_BYTES,
        ),
        cost_estimate=cost,
    )(x_flat, w_fold, bias)


# -------- forward (mirrors InceptionScore.forward) ---------------------------------- #
@functools.partial(jax.jit, static_argnames=("batch_size",))
def inception_score_forward(image_batch, w_cls, b_cls, batch_size=32):
    B, C, H, W = image_batch.shape
    assert B % batch_size == 0, "B must be divisible by batch_size"
    # NOTE: the torch chunk loop over batch_size only bounds peak memory; the model is
    # per-sample independent, so a single fused pass is mathematically identical.

    num_classes = w_cls.shape[1]
    ncp = _round_up(num_classes, LANE)

    # Exact fold of bilinear resize + global average pool into one (H, W) weight:
    #   mean(Ah @ x @ Aw^T) = sum(x * outer(colsum(Ah), colsum(Aw))) / 299^2
    ah = bilinear_matrix(H, OUT_SIZE)                                    # (299, H)
    aw = bilinear_matrix(W, OUT_SIZE)                                    # (299, W)
    w_pool = (jnp.outer(jnp.sum(ah, axis=0), jnp.sum(aw, axis=0))
              / float(OUT_SIZE * OUT_SIZE)).astype(jnp.float32)          # (H, W)

    # Class axis padded to a lane multiple: zero weight columns, -1e30 bias lanes
    # (finite, so 0 * z never produces NaN; exp() of those lanes is exactly 0).
    wc = jnp.pad(w_cls.astype(jnp.float32), ((0, 0), (0, ncp - num_classes)))
    bc = jnp.pad(b_cls.astype(jnp.float32).reshape(1, -1),
                 ((0, 0), (0, ncp - num_classes)), constant_values=-1e30)

    # Fold pool + classifier into a single (C*H*W, ncp) MXU weight.
    # TODO(synk): for real 299x299-scale inputs C*H*W makes this folded weight exceed
    # VMEM; a two-stage split (GAP lane-reduce, then MXU head) would be needed there.
    w_fold = (wc[:, None, :] * w_pool.reshape(1, H * W, 1)).reshape(C * H * W, ncp)

    x_flat = image_batch.reshape(B, C * H * W)          # free reshape, native dtype
    block_rows = _pick_block_rows(B, C * H * W, image_batch.dtype.itemsize)

    parts = _fused_entropy(x_flat, w_fold, bc, batch=B, block_rows=block_rows)
    return jnp.sum(parts[:, 0, 0])                      # scalar entropy sum


if __name__ == "__main__":
    key = jax.random.PRNGKey(0)
    k_img, k_w, k_b = jax.random.split(key, 3)

    B, C, H, W = 4, 3, 16, 16
    batch_size = 2

    image_batch = jax.random.normal(k_img, (B, C, H, W), jnp.float32)
    # deterministic synthetic head weights for the stand-in classifier
    w_cls = jax.random.normal(k_w, (C, NUM_CLASSES), jnp.float32) * 0.1
    b_cls = jax.random.normal(k_b, (1, NUM_CLASSES), jnp.float32) * 0.01

    score = inception_score_forward(image_batch, w_cls, b_cls, batch_size=batch_size)
    jax.block_until_ready(score)

    # pure-JAX reference: explicit 299x299 bilinear resize -> GAP -> linear -> entropy
    ah = bilinear_matrix(H, OUT_SIZE)
    aw = bilinear_matrix(W, OUT_SIZE)
    up = jnp.einsum("oh,bchw,pw->bcop", ah, image_batch, aw)             # (B,C,299,299)
    feat = jnp.mean(up, axis=(2, 3))                                     # (B, C)
    logits = feat @ w_cls + b_cls
    pr = jax.nn.softmax(logits, axis=1)
    ref = jnp.sum(jnp.where(pr > 0, -pr * jnp.log(pr), jnp.zeros_like(pr)))
    assert jnp.allclose(score, ref, rtol=1e-3, atol=1e-3), (score, ref)

    print("KERNEL_OK")
</pallas_src>

<mosaic_0001>
module attributes {stable_mosaic.version = 11 : i64} {
  func.func @_entropy_kernel(%arg0: i32, %arg1: memref<4x768xf32, #tpu.memory_space<vmem>>, %arg2: memref<768x1024xf32, #tpu.memory_space<vmem>>, %arg3: memref<1x1024xf32, #tpu.memory_space<vmem>>, %arg4: memref<1x8x128xf32, #tpu.memory_space<vmem>>) attributes {dimension_semantics = [#tpu.dimension_semantics<parallel>], iteration_bounds = array<i64: 1>, scalar_prefetch = 0 : i64, scratch_operands = 0 : i64, tpu.core_type = #tpu.core_type<tc>, window_params = [{transform_indices = @transform_0, window_bounds = array<i64: 4, 768>}, {pipeline_mode = #tpu.pipeline_mode<synchronous>, transform_indices = @transform_1, window_bounds = array<i64: 768, 1024>}, {pipeline_mode = #tpu.pipeline_mode<synchronous>, transform_indices = @transform_2, window_bounds = array<i64: 1, 1024>}, {transform_indices = @transform_3, window_bounds = array<i64: 1, 8, 128>}]} {
    %c0 = arith.constant 0 : index
    %c0_0 = arith.constant 0 : index
    %0 = vector.load %arg1[%c0, %c0_0] : memref<4x768xf32, #tpu.memory_space<vmem>>, vector<4x768xf32>
    %c0_1 = arith.constant 0 : index
    %c0_2 = arith.constant 0 : index
    %1 = vector.load %arg2[%c0_1, %c0_2] : memref<768x1024xf32, #tpu.memory_space<vmem>>, vector<768x1024xf32>
    %cst = arith.constant dense<0.000000e+00> : vector<4x1024xf32>
    %2 = tpu.matmul %0, %1, %cst {dimension_numbers = #tpu.dot_dimension_numbers<[1], [0], [0], [1], [0, 0, 1, 1], [], []>} : vector<4x768xf32>, vector<768x1024xf32>, vector<4x1024xf32> -> vector<4x1024xf32>
    %c0_3 = arith.constant 0 : index
    %c0_4 = arith.constant 0 : index
    %3 = vector.load %arg3[%c0_3, %c0_4] : memref<1x1024xf32, #tpu.memory_space<vmem>>, vector<1x1024xf32>
    %4 = vector.broadcast %3 : vector<1x1024xf32> to vector<4x1024xf32>
    %5 = arith.addf %2, %4 : vector<4x1024xf32>
    %cst_5 = arith.constant dense<0xFF800000> : vector<4xf32>
    %6 = vector.multi_reduction <maximumf>, %5, %cst_5 [1] : vector<4x1024xf32> to vector<4xf32>
    %7 = vector.shape_cast %6 : vector<4xf32> to vector<4x1xf32>
    %8 = vector.broadcast %7 : vector<4x1xf32> to vector<4x1024xf32>
    %9 = arith.subf %5, %8 : vector<4x1024xf32>
    %10 = math.exp %9 : vector<4x1024xf32>
    %cst_6 = arith.constant dense<0.000000e+00> : vector<4xf32>
    %11 = vector.multi_reduction <add>, %10, %cst_6 [1] : vector<4x1024xf32> to vector<4xf32>
    %12 = vector.shape_cast %11 : vector<4xf32> to vector<4x1xf32>
    %13 = arith.mulf %10, %9 : vector<4x1024xf32>
    %cst_7 = arith.constant dense<0.000000e+00> : vector<4xf32>
    %14 = vector.multi_reduction <add>, %13, %cst_7 [1] : vector<4x1024xf32> to vector<4xf32>
    %15 = vector.shape_cast %14 : vector<4xf32> to vector<4x1xf32>
    %16 = math.log %12 : vector<4x1xf32>
    %17 = tpu.reciprocal %12 {approx = true} : vector<4x1xf32> -> vector<4x1xf32>
    %18 = arith.mulf %15, %17 : vector<4x1xf32>
    %19 = arith.subf %16, %18 : vector<4x1xf32>
    %c4_i32 = arith.constant 4 : i32
    %20 = arith.muli %arg0, %c4_i32 : i32
    %21 = tpu.iota {dimensions = array<i32: 0>} : vector<4x1xi32>
    %22 = vector.broadcast %20 : i32 to vector<4x1xi32>
    %23 = arith.addi %22, %21 : vector<4x1xi32>
    %c4_i32_8 = arith.constant 4 : i32
    %24 = vector.broadcast %c4_i32_8 : i32 to vector<4x1xi32>
    %25 = arith.cmpi slt, %23, %24 : vector<4x1xi32>
    %cst_9 = arith.constant 0.000000e+00 : f32
    %26 = vector.broadcast %cst_9 : f32 to vector<4x1xf32>
    %27 = arith.select %25, %19, %26 : vector<4x1xi1>, vector<4x1xf32>
    %cst_10 = arith.constant dense<0.000000e+00> : vector<1xf32>
    %28 = vector.multi_reduction <add>, %27, %cst_10 [0] : vector<4x1xf32> to vector<1xf32>
    %29 = vector.shape_cast %28 : vector<1xf32> to vector<1x1xf32>
    %30 = vector.shape_cast %29 : vector<1x1xf32> to vector<1x1x1xf32>
    %31 = vector.shape_cast %30 : vector<1x1x1xf32> to vector<1x1x1xf32>
    %32 = vector.broadcast %31 : vector<1x1x1xf32> to vector<1x8x128xf32>
    %c0_11 = arith.constant 0 : index
    %c0_12 = arith.constant 0 : index
    %c0_13 = arith.constant 0 : index
    %33 = vector.load %arg4[%c0_11, %c0_12, %c0_13] : memref<1x8x128xf32, #tpu.memory_space<vmem>>, vector<1x8x128xf32>
    tpu.vector_store %arg4[%c0_11, %c0_12, %c0_13], %32 {strides = array<i32>} : memref<1x8x128xf32, #tpu.memory_space<vmem>>, vector<1x8x128xf32>,
    return
  }
  func.func @transform_0(%arg0: i32) -> (i32, i32) {
    %c0_i32 = arith.constant 0 : i32
    %c0_i32_0 = arith.constant 0 : i32
    return %arg0, %c0_i32 : i32, i32
  }
  func.func @transform_1(%arg0: i32) -> (i32, i32) {
    %c0_i32 = arith.constant 0 : i32
    %c0_i32_0 = arith.constant 0 : i32
    %c0_i32_1 = arith.constant 0 : i32
    return %c0_i32, %c0_i32_0 : i32, i32
  }
  func.func @transform_2(%arg0: i32) -> (i32, i32) {
    %c0_i32 = arith.constant 0 : i32
    %c0_i32_0 = arith.constant 0 : i32
    %c0_i32_1 = arith.constant 0 : i32
    return %c0_i32, %c0_i32_0 : i32, i32
  }
  func.func @transform_3(%arg0: i32) -> (i32, i32, i32) {
    %c0_i32 = arith.constant 0 : i32
    %c0_i32_0 = arith.constant 0 : i32
    %c0_i32_1 = arith.constant 0 : i32
    return %arg0, %c0_i32, %c0_i32_0 : i32, i32, i32
  }
}

</mosaic_0001>

<bundles_post_ra>
// kernel: inception_score_forward.1
= control target key start
LH: loop header
LB: loop body
LE: loop exit
PB: predicated region body
PF: predicated region fallthrough
CT: control target
= control target key end

     0   :  { %vm1688_vm0 = vcmask 1043456   ;;  %s4252_s1 = inlined_call_operand.vmem [shape: f32[768,1024], index: 1, kind: input, shape index: {}]   ;;  %s4253_s0 = inlined_call_operand.vmem [shape: f32[4,768], index: 0, kind: input, shape index: {}]   ;;  %s4254_s2 = inlined_call_operand.vmem [shape: f32[1,1024], index: 2, kind: input, shape index: {}]   ;;  %s4255_s3 = inlined_call_operand.vmem [shape: f32[1,8,128], index: 3, kind: output, shape index: {}]  }
   0x1   :  { %v138_v0 = vld [vmem:[%s4252_s1 + $0x3c8] sm:$0xff]  ;;  %v137_v2 = vld [vmem:[%s4252_s1 + $0x3c0] sm:$0xff] }
   0x2   :  { %v394_v1 = vld [vmem:[%s4252_s1 + $0xbc8] sm:$0xff]  ;;  %836 = vmatprep.subr.mxu0 %v138_v0  ;;  %v393_v3 = vld [vmem:[%s4252_s1 + $0xbc0] sm:$0xff] }
   0x3   :  { %907 = vmatprep.subr.mxu1 %v394_v1  ;;  %v130_v4 = vld [vmem:[%s4252_s1 + $0x388] sm:$0xff]  ;;  %837 = vmatpush1.msra.mxu0 %v137_v2  ;;  %v129_v6 = vld [vmem:[%s4252_s1 + $0x380] sm:$0xff] }
   0x4   :  { %v386_v5 = vld [vmem:[%s4252_s1 + $0xb88] sm:$0xff]  ;;  %908 = vmatpush1.msra.mxu1 %v393_v3  ;;  %v385_v7 = vld [vmem:[%s4252_s1 + $0xb80] sm:$0xff]  ;;  %838 = vmatprep.subr.mxu0 %v130_v4 }
   0x5   :  { %v122_v8 = vld [vmem:[%s4252_s1 + $0x348] sm:$0xff]  ;;  %909 = vmatprep.subr.mxu1 %v386_v5  ;;  %v121_v10 = vld [vmem:[%s4252_s1 + $0x340] sm:$0xff]  ;;  %839 = vmatpush1.msra.mxu0 %v129_v6 }
   0x6   :  { %v378_v9 = vld [vmem:[%s4252_s1 + $0xb48] sm:$0xff]  ;;  %v377_v11 = vld [vmem:[%s4252_s1 + $0xb40] sm:$0xff]  ;;  %910 = vmatpush1.msra.mxu1 %v385_v7  ;;  %840 = vmatprep.subr.mxu0 %v122_v8 }
   0x7   :  { %v114_v12 = vld [vmem:[%s4252_s1 + $0x308] sm:$0xff]  ;;  %911 = vmatprep.subr.mxu1 %v378_v9  ;;  %v113_v14 = vld [vmem:[%s4252_s1 + $0x300] sm:$0xff]  ;;  %841 = vmatpush1.msra.mxu0 %v121_v10 }
   0x8   :  { %v370_v13 = vld [vmem:[%s4252_s1 + $0xb08] sm:$0xff]  ;;  %v369_v15 = vld [vmem:[%s4252_s1 + $0xb00] sm:$0xff]  ;;  %912 = vmatpush1.msra.mxu1 %v377_v11  ;;  %842 = vmatprep.subr.mxu0 %v114_v12 }
   0x9   :  { %v106_v16 = vld [vmem:[%s4252_s1 + $0x2c8] sm:$0xff]  ;;  %913 = vmatprep.subr.mxu1 %v370_v13  ;;  %v105_v18 = vld [vmem:[%s4252_s1 + $0x2c0] sm:$0xff]  ;;  %843 = vmatpush1.msra.mxu0 %v113_v14 }
   0xa   :  { %v362_v17 = vld [vmem:[%s4252_s1 + $0xac8] sm:$0xff]  ;;  %v361_v19 = vld [vmem:[%s4252_s1 + $0xac0] sm:$0xff]  ;;  %914 = vmatpush1.msra.mxu1 %v369_v15  ;;  %844 = vmatprep.subr.mxu0 %v106_v16 }
   0xb   :  { %v98_v20 = vld [vmem:[%s4252_s1 + $0x288] sm:$0xff]  ;;  %915 = vmatprep.subr.mxu1 %v362_v17  ;;  %v97_v22 = vld [vmem:[%s4252_s1 + $0x280] sm:$0xff]  ;;  %845 = vmatpush1.msra.mxu0 %v105_v18 }
   0xc   :  { %v354_v21 = vld [vmem:[%s4252_s1 + $0xa88] sm:$0xff]  ;;  %v353_v23 = vld [vmem:[%s4252_s1 + $0xa80] sm:$0xff]  ;;  %916 = vmatpush1.msra.mxu1 %v361_v19  ;;  %846 = vmatprep.subr.mxu0 %v98_v20 }
   0xd   :  { %v90_v24 = vld [vmem:[%s4252_s1 + $0x248] sm:$0xff]  ;;  %917 = vmatprep.subr.mxu1 %v354_v21  ;;  %v89_v26 = vld [vmem:[%s4252_s1 + $0x240] sm:$0xff]  ;;  %847 = vmatpush1.msra.mxu0 %v97_v22 }
   0xe   :  { %v346_v25 = vld [vmem:[%s4252_s1 + $0xa48] sm:$0xff]  ;;  %v345_v27 = vld [vmem:[%s4252_s1 + $0xa40] sm:$0xff]  ;;  %918 = vmatpush1.msra.mxu1 %v353_v23  ;;  %848 = vmatprep.subr.mxu0 %v90_v24 }
   0xf   :  { %v82_v28 = vld [vmem:[%s4252_s1 + $0x208] sm:$0xff]  ;;  %919 = vmatprep.subr.mxu1 %v346_v25  ;;  %v81_v30 = vld [vmem:[%s4252_s1 + $0x200] sm:$0xff]  ;;  %849 = vmatpush1.msra.mxu0 %v89_v26 }
  0x10   :  { %v338_v29 = vld [vmem:[%s4252_s1 + $0xa08] sm:$0xff]  ;;  %v337_v31 = vld [vmem:[%s4252_s1 + $0xa00] sm:$0xff]  ;;  %920 = vmatpush1.msra.mxu1 %v345_v27  ;;  %850 = vmatprep.subr.mxu0 %v82_v28 }
  0x11   :  { %v74_v32 = vld [vmem:[%s4252_s1 + $0x1c8] sm:$0xff]  ;;  %921 = vmatprep.subr.mxu1 %v338_v29  ;;  %v73_v34 = vld [vmem:[%s4252_s1 + $0x1c0] sm:$0xff]  ;;  %851 = vmatpush1.msra.mxu0 %v81_v30 }
  0x12   :  { %v330_v33 = vld [vmem:[%s4252_s1 + $0x9c8] sm:$0xff]  ;;  %v329_v35 = vld [vmem:[%s4252_s1 + $0x9c0] sm:$0xff]  ;;  %922 = vmatpush1.msra.mxu1 %v337_v31  ;;  %852 = vmatprep.subr.mxu0 %v74_v32 }
  0x13   :  { %v66_v36 = vld [vmem:[%s4252_s1 + $0x188] sm:$0xff]  ;;  %923 = vmatprep.subr.mxu1 %v330_v33  ;;  %v65_v38 = vld [vmem:[%s4252_s1 + $0x180] sm:$0xff]  ;;  %853 = vmatpush1.msra.mxu0 %v73_v34 }
  0x14   :  { %v322_v37 = vld [vmem:[%s4252_s1 + $0x988] sm:$0xff]  ;;  %v321_v39 = vld [vmem:[%s4252_s1 + $0x980] sm:$0xff]  ;;  %924 = vmatpush1.msra.mxu1 %v329_v35  ;;  %854 = vmatprep.subr.mxu0 %v66_v36 }
  0x15   :  { %v58_v40 = vld [vmem:[%s4252_s1 + $0x148] sm:$0xff]  ;;  %925 = vmatprep.subr.mxu1 %v322_v37  ;;  %v57_v42 = vld [vmem:[%s4252_s1 + $0x140] sm:$0xff]  ;;  %855 = vmatpush1.msra.mxu0 %v65_v38 }
  0x16   :  { %v314_v41 = vld [vmem:[%s4252_s1 + $0x948] sm:$0xff]  ;;  %v313_v43 = vld [vmem:[%s4252_s1 + $0x940] sm:$0xff]  ;;  %926 = vmatpush1.msra.mxu1 %v321_v39  ;;  %856 = vmatprep.subr.mxu0 %v58_v40 }
  0x17   :  { %v50_v44 = vld [vmem:[%s4252_s1 + $0x108] sm:$0xff]  ;;  %927 = vmatprep.subr.mxu1 %v314_v41  ;;  %v49_v46 = vld [vmem:[%s4252_s1 + $0x100] sm:$0xff]  ;;  %857 = vmatpush1.msra.mxu0 %v57_v42 }
  0x18   :  { %v306_v45 = vld [vmem:[%s4252_s1 + $0x908] sm:$0xff]  ;;  %v305_v47 = vld [vmem:[%s4252_s1 + $0x900] sm:$0xff]  ;;  %928 = vmatpush1.msra.mxu1 %v313_v43  ;;  %858 = vmatprep.subr.mxu0 %v50_v44 }
  0x19   :  { %v42_v48 = vld [vmem:[%s4252_s1 + $0xc8] sm:$0xff]  ;;  %929 = vmatprep.subr.mxu1 %v306_v45  ;;  %v41_v50 = vld [vmem:[%s4252_s1 + $0xc0] sm:$0xff]  ;;  %859 = vmatpush1.msra.mxu0 %v49_v46 }
  0x1a   :  { %v298_v49 = vld [vmem:[%s4252_s1 + $0x8c8] sm:$0xff]  ;;  %v297_v51 = vld [vmem:[%s4252_s1 + $0x8c0] sm:$0xff]  ;;  %930 = vmatpush1.msra.mxu1 %v305_v47  ;;  %860 = vmatprep.subr.mxu0 %v42_v48 }
  0x1b   :  { %v34_v52 = vld [vmem:[%s4252_s1 + $0x88] sm:$0xff]  ;;  %931 = vmatprep.subr.mxu1 %v298_v49  ;;  %v33_v54 = vld [vmem:[%s4252_s1 + $0x80] sm:$0xff]  ;;  %861 = vmatpush1.msra.mxu0 %v41_v50 }
  0x1c   :  { %v290_v53 = vld [vmem:[%s4252_s1 + $0x888] sm:$0xff]  ;;  %v289_v55 = vld [vmem:[%s4252_s1 + $0x880] sm:$0xff]  ;;  %932 = vmatpush1.msra.mxu1 %v297_v51  ;;  %862 = vmatprep.subr.mxu0 %v34_v52 }
  0x1d   :  { %v26_v56 = vld [vmem:[%s4252_s1 + $0x48] sm:$0xff]  ;;  %933 = vmatprep.subr.mxu1 %v290_v53  ;;  %v25_v58 = vld [vmem:[%s4252_s1 + $0x40] sm:$0xff]  ;;  %863 = vmatpush1.msra.mxu0 %v33_v54 }
  0x1e   :  { %v282_v57 = vld [vmem:[%s4252_s1 + $0x848] sm:$0xff]  ;;  %v281_v59 = vld [vmem:[%s4252_s1 + $0x840] sm:$0xff]  ;;  %934 = vmatpush1.msra.mxu1 %v289_v55  ;;  %864 = vmatprep.subr.mxu0 %v26_v56 }
  0x1f   :  { %v18_v60 = vld [vmem:[%s4252_s1 + $0x8] sm:$0xff]  ;;  %935 = vmatprep.subr.mxu1 %v282_v57  ;;  %v17_v62 = vld [vmem:[%s4252_s1] sm:$0xff]  ;;  %865 = vmatpush1.msra.mxu0 %v25_v58 }
  0x20   :  { %v274_v61 = vld [vmem:[%s4252_s1 + $0x808] sm:$0xff]  ;;  %v273_v63 = vld [vmem:[%s4252_s1 + $0x800] sm:$0xff]  ;;  %936 = vmatpush1.msra.mxu1 %v281_v59  ;;  %866 = vmatprep.subr.mxu0 %v18_v60 }
  0x21   :  { %v266_v0 = vld [vmem:[%s4252_s1 + $0x7c8] sm:$0xff]  ;;  %937 = vmatprep.subr.mxu1 %v274_v61  ;;  %v265_v2 = vld [vmem:[%s4252_s1 + $0x7c0] sm:$0xff]  ;;  %867 = vmatpush1.msra.mxu0 %v17_v62 }
  0x22   :  { %v522_v1 = vld [vmem:[%s4252_s1 + $0xfc8] sm:$0xff]  ;;  %v521_v3 = vld [vmem:[%s4252_s1 + $0xfc0] sm:$0xff]  ;;  %938 = vmatpush1.msra.mxu1 %v273_v63  ;;  %868 = vmatprep.subr.mxu0 %v266_v0 }
  0x23   :  { %v258_v4 = vld [vmem:[%s4252_s1 + $0x788] sm:$0xff]  ;;  %939 = vmatprep.subr.mxu1 %v522_v1  ;;  %v257_v6 = vld [vmem:[%s4252_s1 + $0x780] sm:$0xff]  ;;  %869 = vmatpush2.msra.mxu0 %v265_v2 }
  0x24   :  { %v514_v5 = vld [vmem:[%s4252_s1 + $0xf88] sm:$0xff]  ;;  %v513_v7 = vld [vmem:[%s4252_s1 + $0xf80] sm:$0xff]  ;;  %940 = vmatpush2.msra.mxu1 %v521_v3  ;;  %870 = vmatprep.subr.mxu0 %v258_v4 }
  0x25   :  { %v250_v8 = vld [vmem:[%s4252_s1 + $0x748] sm:$0xff]  ;;  %941 = vmatprep.subr.mxu1 %v514_v5  ;;  %v249_v10 = vld [vmem:[%s4252_s1 + $0x740] sm:$0xff]  ;;  %871 = vmatpush2.msra.mxu0 %v257_v6  ;;  %v140_v5 = vld [vmem:[%s4252_s1 + $0x3d8] sm:$0xff] }
  0x26   :  { %v506_v9 = vld [vmem:[%s4252_s1 + $0xf48] sm:$0xff]  ;;  %v505_v11 = vld [vmem:[%s4252_s1 + $0xf40] sm:$0xff]  ;;  %942 = vmatpush2.msra.mxu1 %v513_v7  ;;  %872 = vmatprep.subr.mxu0 %v250_v8  ;;  %v139_v7 = vld [vmem:[%s4252_s1 + $0x3d0] sm:$0xff] }
  0x27   :  { %v242_v12 = vld [vmem:[%s4252_s1 + $0x708] sm:$0xff]  ;;  %943 = vmatprep.subr.mxu1 %v506_v9  ;;  %v241_v14 = vld [vmem:[%s4252_s1 + $0x700] sm:$0xff]  ;;  %873 = vmatpush2.msra.mxu0 %v249_v10  ;;  %v132_v9 = vld [vmem:[%s4252_s1 + $0x398] sm:$0xff] }
  0x28   :  { %v498_v13 = vld [vmem:[%s4252_s1 + $0xf08] sm:$0xff]  ;;  %v497_v15 = vld [vmem:[%s4252_s1 + $0xf00] sm:$0xff]  ;;  %944 = vmatpush2.msra.mxu1 %v505_v11  ;;  %874 = vmatprep.subr.mxu0 %v242_v12  ;;  %v131_v11 = vld [vmem:[%s4252_s1 + $0x390] sm:$0xff] }
  0x29   :  { %v234_v16 = vld [vmem:[%s4252_s1 + $0x6c8] sm:$0xff]  ;;  %945 = vmatprep.subr.mxu1 %v498_v13  ;;  %v233_v18 = vld [vmem:[%s4252_s1 + $0x6c0] sm:$0xff]  ;;  %875 = vmatpush2.msra.mxu0 %v241_v14  ;;  %v124_v13 = vld [vmem:[%s4252_s1 + $0x358] sm:$0xff] }
  0x2a   :  { %v490_v17 = vld [vmem:[%s4252_s1 + $0xec8] sm:$0xff]  ;;  %v489_v19 = vld [vmem:[%s4252_s1 + $0xec0] sm:$0xff]  ;;  %946 = vmatpush2.msra.mxu1 %v497_v15  ;;  %876 = vmatprep.subr.mxu0 %v234_v16  ;;  %v123_v15 = vld [vmem:[%s4252_s1 + $0x350] sm:$0xff] }
  0x2b   :  { %v226_v20 = vld [vmem:[%s4252_s1 + $0x688] sm:$0xff]  ;;  %947 = vmatprep.subr.mxu1 %v490_v17  ;;  %v225_v22 = vld [vmem:[%s4252_s1 + $0x680] sm:$0xff]  ;;  %877 = vmatpush2.msra.mxu0 %v233_v18  ;;  %v116_v17 = vld [vmem:[%s4252_s1 + $0x318] sm:$0xff] }
  0x2c   :  { %v482_v21 = vld [vmem:[%s4252_s1 + $0xe88] sm:$0xff]  ;;  %v481_v23 = vld [vmem:[%s4252_s1 + $0xe80] sm:$0xff]  ;;  %948 = vmatpush2.msra.mxu1 %v489_v19  ;;  %878 = vmatprep.subr.mxu0 %v226_v20  ;;  %v115_v19 = vld [vmem:[%s4252_s1 + $0x310] sm:$0xff] }
  0x2d   :  { %v218_v24 = vld [vmem:[%s4252_s1 + $0x648] sm:$0xff]  ;;  %949 = vmatprep.subr.mxu1 %v482_v21  ;;  %v217_v26 = vld [vmem:[%s4252_s1 + $0x640] sm:$0xff]  ;;  %879 = vmatpush2.msra.mxu0 %v225_v22  ;;  %v108_v21 = vld [vmem:[%s4252_s1 + $0x2d8] sm:$0xff] }
  0x2e   :  { %v474_v25 = vld [vmem:[%s4252_s1 + $0xe48] sm:$0xff]  ;;  %v473_v27 = vld [vmem:[%s4252_s1 + $0xe40] sm:$0xff]  ;;  %950 = vmatpush2.msra.mxu1 %v481_v23  ;;  %880 = vmatprep.subr.mxu0 %v218_v24  ;;  %v107_v23 = vld [vmem:[%s4252_s1 + $0x2d0] sm:$0xff] }
  0x2f   :  { %v210_v28 = vld [vmem:[%s4252_s1 + $0x608] sm:$0xff]  ;;  %951 = vmatprep.subr.mxu1 %v474_v25  ;;  %v209_v30 = vld [vmem:[%s4252_s1 + $0x600] sm:$0xff]  ;;  %881 = vmatpush2.msra.mxu0 %v217_v26  ;;  %v100_v25 = vld [vmem:[%s4252_s1 + $0x298] sm:$0xff] }
  0x30   :  { %v466_v29 = vld [vmem:[%s4252_s1 + $0xe08] sm:$0xff]  ;;  %v465_v31 = vld [vmem:[%s4252_s1 + $0xe00] sm:$0xff]  ;;  %952 = vmatpush2.msra.mxu1 %v473_v27  ;;  %882 = vmatprep.subr.mxu0 %v210_v28  ;;  %v99_v27 = vld [vmem:[%s4252_s1 + $0x290] sm:$0xff] }
  0x31   :  { %v202_v32 = vld [vmem:[%s4252_s1 + $0x5c8] sm:$0xff]  ;;  %953 = vmatprep.subr.mxu1 %v466_v29  ;;  %v201_v34 = vld [vmem:[%s4252_s1 + $0x5c0] sm:$0xff]  ;;  %883 = vmatpush2.msra.mxu0 %v209_v30  ;;  %v92_v29 = vld [vmem:[%s4252_s1 + $0x258] sm:$0xff] }
  0x32   :  { %v458_v33 = vld [vmem:[%s4252_s1 + $0xdc8] sm:$0xff]  ;;  %v457_v35 = vld [vmem:[%s4252_s1 + $0xdc0] sm:$0xff]  ;;  %954 = vmatpush2.msra.mxu1 %v465_v31  ;;  %884 = vmatprep.subr.mxu0 %v202_v32  ;;  %v91_v31 = vld [vmem:[%s4252_s1 + $0x250] sm:$0xff] }
  0x33   :  { %v194_v36 = vld [vmem:[%s4252_s1 + $0x588] sm:$0xff]  ;;  %955 = vmatprep.subr.mxu1 %v458_v33  ;;  %v193_v38 = vld [vmem:[%s4252_s1 + $0x580] sm:$0xff]  ;;  %885 = vmatpush2.msra.mxu0 %v201_v34  ;;  %v84_v33 = vld [vmem:[%s4252_s1 + $0x218] sm:$0xff] }
  0x34   :  { %v450_v37 = vld [vmem:[%s4252_s1 + $0xd88] sm:$0xff]  ;;  %v449_v39 = vld [vmem:[%s4252_s1 + $0xd80] sm:$0xff]  ;;  %956 = vmatpush2.msra.mxu1 %v457_v35  ;;  %886 = vmatprep.subr.mxu0 %v194_v36  ;;  %v83_v35 = vld [vmem:[%s4252_s1 + $0x210] sm:$0xff] }
  0x35   :  { %v186_v40 = vld [vmem:[%s4252_s1 + $0x548] sm:$0xff]  ;;  %957 = vmatprep.subr.mxu1 %v450_v37  ;;  %v185_v42 = vld [vmem:[%s4252_s1 + $0x540] sm:$0xff]  ;;  %887 = vmatpush2.msra.mxu0 %v193_v38  ;;  %v76_v37 = vld [vmem:[%s4252_s1 + $0x1d8] sm:$0xff] }
  0x36   :  { %v442_v41 = vld [vmem:[%s4252_s1 + $0xd48] sm:$0xff]  ;;  %v441_v43 = vld [vmem:[%s4252_s1 + $0xd40] sm:$0xff]  ;;  %958 = vmatpush2.msra.mxu1 %v449_v39  ;;  %888 = vmatprep.subr.mxu0 %v186_v40  ;;  %v75_v39 = vld [vmem:[%s4252_s1 + $0x1d0] sm:$0xff] }
  0x37   :  { %v178_v44 = vld [vmem:[%s4252_s1 + $0x508] sm:$0xff]  ;;  %959 = vmatprep.subr.mxu1 %v442_v41  ;;  %v177_v46 = vld [vmem:[%s4252_s1 + $0x500] sm:$0xff]  ;;  %889 = vmatpush2.msra.mxu0 %v185_v42  ;;  %v68_v41 = vld [vmem:[%s4252_s1 + $0x198] sm:$0xff] }
  0x38   :  { %v434_v45 = vld [vmem:[%s4252_s1 + $0xd08] sm:$0xff]  ;;  %v433_v47 = vld [vmem:[%s4252_s1 + $0xd00] sm:$0xff]  ;;  %960 = vmatpush2.msra.mxu1 %v441_v43  ;;  %890 = vmatprep.subr.mxu0 %v178_v44  ;;  %v67_v43 = vld [vmem:[%s4252_s1 + $0x190] sm:$0xff] }
  0x39   :  { %v170_v48 = vld [vmem:[%s4252_s1 + $0x4c8] sm:$0xff]  ;;  %961 = vmatprep.subr.mxu1 %v434_v45  ;;  %v169_v50 = vld [vmem:[%s4252_s1 + $0x4c0] sm:$0xff]  ;;  %891 = vmatpush2.msra.mxu0 %v177_v46  ;;  %v60_v45 = vld [vmem:[%s4252_s1 + $0x158] sm:$0xff] }
  0x3a   :  { %v426_v49 = vld [vmem:[%s4252_s1 + $0xcc8] sm:$0xff]  ;;  %v425_v51 = vld [vmem:[%s4252_s1 + $0xcc0] sm:$0xff]  ;;  %962 = vmatpush2.msra.mxu1 %v433_v47  ;;  %892 = vmatprep.subr.mxu0 %v170_v48  ;;  %v59_v47 = vld [vmem:[%s4252_s1 + $0x150] sm:$0xff] }
  0x3b   :  { %v162_v52 = vld [vmem:[%s4252_s1 + $0x488] sm:$0xff]  ;;  %963 = vmatprep.subr.mxu1 %v426_v49  ;;  %v161_v54 = vld [vmem:[%s4252_s1 + $0x480] sm:$0xff]  ;;  %893 = vmatpush2.msra.mxu0 %v169_v50  ;;  %v52_v49 = vld [vmem:[%s4252_s1 + $0x118] sm:$0xff] }
  0x3c   :  { %v418_v53 = vld [vmem:[%s4252_s1 + $0xc88] sm:$0xff]  ;;  %v417_v55 = vld [vmem:[%s4252_s1 + $0xc80] sm:$0xff]  ;;  %964 = vmatpush2.msra.mxu1 %v425_v51  ;;  %894 = vmatprep.subr.mxu0 %v162_v52  ;;  %v51_v51 = vld [vmem:[%s4252_s1 + $0x110] sm:$0xff] }
  0x3d   :  { %v2206_v56 = vld [vmem:[%s4253_s0] sm:$0xff]  ;;  %v154_v57 = vld [vmem:[%s4252_s1 + $0x448] sm:$0xff]  ;;  %965 = vmatprep.subr.mxu1 %v418_v53  ;;  %895 = vmatpush2.msra.mxu0 %v161_v54  ;;  %v44_v53 = vld [vmem:[%s4252_s1 + $0xd8] sm:$0xff] }
  0x3e   :  { %v410_v58 = vld [vmem:[%s4252_s1 + $0xc48] sm:$0xff]  ;;  %v153_v59 = vld [vmem:[%s4252_s1 + $0x440] sm:$0xff]  ;;  %966 = vmatpush2.msra.mxu1 %v417_v55  ;;  %v2231_v0 = vcombine.high %v2206_v56, %v2206_v56  ;;  %896 = vmatprep.subr.mxu0 %v154_v57  ;;  %v43_v55 = vld [vmem:[%s4252_s1 + $0xd0] sm:$0xff] }
  0x3f   :  { %v409_v60 = vld [vmem:[%s4252_s1 + $0xc40] sm:$0xff]  ;;  %v15_v61 = vld [vmem:[%s4253_s0 + $0x8] sm:$0xff]  ;;  %967 = vmatprep.subr.mxu1 %v410_v58  ;;  %897 = vmatpush2.msra.mxu0 %v153_v59  ;;  %v36_v58 = vld [vmem:[%s4252_s1 + $0x98] sm:$0xff] }
  0x40   :  { %v146_v62 = vld [vmem:[%s4252_s1 + $0x408] sm:$0xff]  ;;  %v145_v1 = vld [vmem:[%s4252_s1 + $0x400] sm:$0xff]  ;;  %968 = vmatpush2.msra.mxu1 %v409_v60  ;;  %v2239_v3 = vcombine.high %v15_v61, %v15_v61  ;;  %900 = vmatprep.mubr.f32.mxu0 %v2231_v0  ;;  %v35_v60 = vld [vmem:[%s4252_s1 + $0x90] sm:$0xff] }
  0x41   :  { %v402_v63 = vld [vmem:[%s4252_s1 + $0xc08] sm:$0xff]  ;;  %v401_v2 = vld [vmem:[%s4252_s1 + $0xc00] sm:$0xff]  ;;  %898 = vmatprep.subr.mxu0 %v146_v62  ;;  %v28_v62 = vld [vmem:[%s4252_s1 + $0x58] sm:$0xff] }
  0x42   :  { %969 = vmatprep.subr.mxu1 %v402_v63  ;;  %v650_v4 = vld [vmem:[%s4252_s1 + $0x13c8] sm:$0xff]  ;;  %899 = vmatpush2.msra.mxu0 %v145_v1  ;;  %v649_v6 = vld [vmem:[%s4252_s1 + $0x13c0] sm:$0xff]  ;;  %v27_v1 = vld [vmem:[%s4252_s1 + $0x50] sm:$0xff] }
  0x43   :  { %970 = vmatpush2.msra.mxu1 %v401_v2  ;;  %901 = vmatmul.mubr.f32.vlgmr.msra.gmra.mxu0 %v2206_v56  ;;  %v642_v8 = vld [vmem:[%s4252_s1 + $0x1388] sm:$0xff]  ;;  %v641_v10 = vld [vmem:[%s4252_s1 + $0x1380] sm:$0xff] }
  0x44   :  { %971 = vmatprep.mubr.f32.mxu1 %v2239_v3  ;;  %978 = vmatprep.subr.mxu0 %v650_v4  ;;  %v634_v12 = vld [vmem:[%s4252_s1 + $0x1348] sm:$0xff]  ;;  %v633_v14 = vld [vmem:[%s4252_s1 + $0x1340] sm:$0xff]  ;;  %v20_v4 = vld [vmem:[%s4252_s1 + $0x18] sm:$0xff] }
  0x45   :  { %1049 = vmatprep.subr.mxu1 %v140_v5  ;;  %972 = vmatmul.mubr.f32.vlgmr.msra.gmra.mxu1 %v15_v61  ;;  %v626_v16 = vld [vmem:[%s4252_s1 + $0x1308] sm:$0xff]  ;;  %v625_v18 = vld [vmem:[%s4252_s1 + $0x1300] sm:$0xff] }
  0x46   :  { %979 = vmatpush1.msra.mxu0 %v649_v6  ;;  %1050 = vmatpush1.msra.mxu1 %v139_v7  ;;  %v618_v20 = vld [vmem:[%s4252_s1 + $0x12c8] sm:$0xff]  ;;  %v617_v22 = vld [vmem:[%s4252_s1 + $0x12c0] sm:$0xff]  ;;  %v19_v6 = vld [vmem:[%s4252_s1 + $0x10] sm:$0xff] }
  0x47   :  { %980 = vmatprep.subr.mxu0 %v642_v8  ;;  %1051 = vmatprep.subr.mxu1 %v132_v9  ;;  %v610_v24 = vld [vmem:[%s4252_s1 + $0x1288] sm:$0xff]  ;;  %v609_v26 = vld [vmem:[%s4252_s1 + $0x1280] sm:$0xff]  ;;  %v268_v8 = vld [vmem:[%s4252_s1 + $0x7d8] sm:$0xff] }
  0x48   :  { %981 = vmatpush1.msra.mxu0 %v641_v10  ;;  %1052 = vmatpush1.msra.mxu1 %v131_v11  ;;  %v602_v28 = vld [vmem:[%s4252_s1 + $0x1248] sm:$0xff]  ;;  %v601_v30 = vld [vmem:[%s4252_s1 + $0x1240] sm:$0xff]  ;;  %v267_v10 = vld [vmem:[%s4252_s1 + $0x7d0] sm:$0xff] }
  0x49   :  { %982 = vmatprep.subr.mxu0 %v634_v12  ;;  %1053 = vmatprep.subr.mxu1 %v124_v13  ;;  %v594_v32 = vld [vmem:[%s4252_s1 + $0x1208] sm:$0xff]  ;;  %v593_v34 = vld [vmem:[%s4252_s1 + $0x1200] sm:$0xff]  ;;  %v260_v12 = vld [vmem:[%s4252_s1 + $0x798] sm:$0xff] }
  0x4a   :  { %983 = vmatpush1.msra.mxu0 %v633_v14  ;;  %1054 = vmatpush1.msra.mxu1 %v123_v15  ;;  %v586_v36 = vld [vmem:[%s4252_s1 + $0x11c8] sm:$0xff]  ;;  %v585_v38 = vld [vmem:[%s4252_s1 + $0x11c0] sm:$0xff]  ;;  %v259_v14 = vld [vmem:[%s4252_s1 + $0x790] sm:$0xff] }
  0x4b   :  { %984 = vmatprep.subr.mxu0 %v626_v16  ;;  %1055 = vmatprep.subr.mxu1 %v116_v17  ;;  %v578_v40 = vld [vmem:[%s4252_s1 + $0x1188] sm:$0xff]  ;;  %v577_v42 = vld [vmem:[%s4252_s1 + $0x1180] sm:$0xff]  ;;  %v252_v16 = vld [vmem:[%s4252_s1 + $0x758] sm:$0xff] }
  0x4c   :  { %985 = vmatpush1.msra.mxu0 %v625_v18  ;;  %1056 = vmatpush1.msra.mxu1 %v115_v19  ;;  %v570_v44 = vld [vmem:[%s4252_s1 + $0x1148] sm:$0xff]  ;;  %v569_v46 = vld [vmem:[%s4252_s1 + $0x1140] sm:$0xff]  ;;  %v251_v18 = vld [vmem:[%s4252_s1 + $0x750] sm:$0xff] }
  0x4d   :  { %986 = vmatprep.subr.mxu0 %v618_v20  ;;  %1057 = vmatprep.subr.mxu1 %v108_v21  ;;  %v562_v48 = vld [vmem:[%s4252_s1 + $0x1108] sm:$0xff]  ;;  %v561_v50 = vld [vmem:[%s4252_s1 + $0x1100] sm:$0xff]  ;;  %v244_v20 = vld [vmem:[%s4252_s1 + $0x718] sm:$0xff] }
  0x4e   :  { %987 = vmatpush1.msra.mxu0 %v617_v22  ;;  %1058 = vmatpush1.msra.mxu1 %v107_v23  ;;  %v554_v52 = vld [vmem:[%s4252_s1 + $0x10c8] sm:$0xff]  ;;  %v553_v54 = vld [vmem:[%s4252_s1 + $0x10c0] sm:$0xff]  ;;  %v243_v22 = vld [vmem:[%s4252_s1 + $0x710] sm:$0xff] }
  0x4f   :  { %988 = vmatprep.subr.mxu0 %v610_v24  ;;  %1059 = vmatprep.subr.mxu1 %v100_v25  ;;  %v546_v57 = vld [vmem:[%s4252_s1 + $0x1088] sm:$0xff]  ;;  %v545_v59 = vld [vmem:[%s4252_s1 + $0x1080] sm:$0xff]  ;;  %v236_v24 = vld [vmem:[%s4252_s1 + $0x6d8] sm:$0xff] }
  0x50   :  { %989 = vmatpush1.msra.mxu0 %v609_v26  ;;  %1060 = vmatpush1.msra.mxu1 %v99_v27  ;;  %v538_v61 = vld [vmem:[%s4252_s1 + $0x1048] sm:$0xff]  ;;  %v537_v63 = vld [vmem:[%s4252_s1 + $0x1040] sm:$0xff]  ;;  %v235_v26 = vld [vmem:[%s4252_s1 + $0x6d0] sm:$0xff] }
  0x51   :  { %990 = vmatprep.subr.mxu0 %v602_v28  ;;  %1061 = vmatprep.subr.mxu1 %v92_v29  ;;  %v530_v2 = vld [vmem:[%s4252_s1 + $0x1008] sm:$0xff]  ;;  %v529_v5 = vld [vmem:[%s4252_s1 + $0x1000] sm:$0xff]  ;;  %v228_v28 = vld [vmem:[%s4252_s1 + $0x698] sm:$0xff] }
  0x52   :  { %991 = vmatpush1.msra.mxu0 %v601_v30  ;;  %1062 = vmatpush1.msra.mxu1 %v91_v31  ;;  %v778_v7 = vld [vmem:[%s4252_s1 + $0x17c8] sm:$0xff]  ;;  %v777_v9 = vld [vmem:[%s4252_s1 + $0x17c0] sm:$0xff]  ;;  %v227_v30 = vld [vmem:[%s4252_s1 + $0x690] sm:$0xff] }
  0x53   :  { %992 = vmatprep.subr.mxu0 %v594_v32  ;;  %1063 = vmatprep.subr.mxu1 %v84_v33  ;;  %v770_v11 = vld [vmem:[%s4252_s1 + $0x1788] sm:$0xff]  ;;  %v769_v13 = vld [vmem:[%s4252_s1 + $0x1780] sm:$0xff]  ;;  %v220_v32 = vld [vmem:[%s4252_s1 + $0x658] sm:$0xff] }
  0x54   :  { %993 = vmatpush1.msra.mxu0 %v593_v34  ;;  %1064 = vmatpush1.msra.mxu1 %v83_v35  ;;  %v762_v15 = vld [vmem:[%s4252_s1 + $0x1748] sm:$0xff]  ;;  %v761_v17 = vld [vmem:[%s4252_s1 + $0x1740] sm:$0xff]  ;;  %v219_v34 = vld [vmem:[%s4252_s1 + $0x650] sm:$0xff] }
  0x55   :  { %994 = vmatprep.subr.mxu0 %v586_v36  ;;  %1065 = vmatprep.subr.mxu1 %v76_v37  ;;  %v754_v19 = vld [vmem:[%s4252_s1 + $0x1708] sm:$0xff]  ;;  %v753_v21 = vld [vmem:[%s4252_s1 + $0x1700] sm:$0xff]  ;;  %v212_v36 = vld [vmem:[%s4252_s1 + $0x618] sm:$0xff] }
  0x56   :  { %995 = vmatpush1.msra.mxu0 %v585_v38  ;;  %1066 = vmatpush1.msra.mxu1 %v75_v39  ;;  %v746_v23 = vld [vmem:[%s4252_s1 + $0x16c8] sm:$0xff]  ;;  %v745_v25 = vld [vmem:[%s4252_s1 + $0x16c0] sm:$0xff]  ;;  %v211_v38 = vld [vmem:[%s4252_s1 + $0x610] sm:$0xff] }
  0x57   :  { %996 = vmatprep.subr.mxu0 %v578_v40  ;;  %1067 = vmatprep.subr.mxu1 %v68_v41  ;;  %v738_v27 = vld [vmem:[%s4252_s1 + $0x1688] sm:$0xff]  ;;  %v737_v29 = vld [vmem:[%s4252_s1 + $0x1680] sm:$0xff]  ;;  %v204_v40 = vld [vmem:[%s4252_s1 + $0x5d8] sm:$0xff] }
  0x58   :  { %997 = vmatpush1.msra.mxu0 %v577_v42  ;;  %1068 = vmatpush1.msra.mxu1 %v67_v43  ;;  %v730_v31 = vld [vmem:[%s4252_s1 + $0x1648] sm:$0xff]  ;;  %v729_v33 = vld [vmem:[%s4252_s1 + $0x1640] sm:$0xff]  ;;  %v203_v42 = vld [vmem:[%s4252_s1 + $0x5d0] sm:$0xff] }
  0x59   :  { %998 = vmatprep.subr.mxu0 %v570_v44  ;;  %1069 = vmatprep.subr.mxu1 %v60_v45  ;;  %v722_v35 = vld [vmem:[%s4252_s1 + $0x1608] sm:$0xff]  ;;  %v721_v37 = vld [vmem:[%s4252_s1 + $0x1600] sm:$0xff]  ;;  %v196_v44 = vld [vmem:[%s4252_s1 + $0x598] sm:$0xff] }
  0x5a   :  { %999 = vmatpush1.msra.mxu0 %v569_v46  ;;  %1070 = vmatpush1.msra.mxu1 %v59_v47  ;;  %v714_v39 = vld [vmem:[%s4252_s1 + $0x15c8] sm:$0xff]  ;;  %v713_v41 = vld [vmem:[%s4252_s1 + $0x15c0] sm:$0xff]  ;;  %v195_v46 = vld [vmem:[%s4252_s1 + $0x590] sm:$0xff] }
  0x5b   :  { %1000 = vmatprep.subr.mxu0 %v562_v48  ;;  %1071 = vmatprep.subr.mxu1 %v52_v49  ;;  %v706_v43 = vld [vmem:[%s4252_s1 + $0x1588] sm:$0xff]  ;;  %v705_v45 = vld [vmem:[%s4252_s1 + $0x1580] sm:$0xff]  ;;  %v188_v48 = vld [vmem:[%s4252_s1 + $0x558] sm:$0xff] }
  0x5c   :  { %1001 = vmatpush1.msra.mxu0 %v561_v50  ;;  %1072 = vmatpush1.msra.mxu1 %v51_v51  ;;  %v698_v47 = vld [vmem:[%s4252_s1 + $0x1548] sm:$0xff]  ;;  %v697_v49 = vld [vmem:[%s4252_s1 + $0x1540] sm:$0xff]  ;;  %v187_v50 = vld [vmem:[%s4252_s1 + $0x550] sm:$0xff] }
  0x5d   :  { %1002 = vmatprep.subr.mxu0 %v554_v52  ;;  %1073 = vmatprep.subr.mxu1 %v44_v53  ;;  %v690_v51 = vld [vmem:[%s4252_s1 + $0x1508] sm:$0xff]  ;;  %v180_v52 = vld [vmem:[%s4252_s1 + $0x518] sm:$0xff]  ;;  %v689_v53 = vld [vmem:[%s4252_s1 + $0x1500] sm:$0xff] }
  0x5e   :  { %1003 = vmatpush1.msra.mxu0 %v553_v54  ;;  %1074 = vmatpush1.msra.mxu1 %v43_v55  ;;  %v179_v54 = vld [vmem:[%s4252_s1 + $0x510] sm:$0xff]  ;;  %v682_v55 = vld [vmem:[%s4252_s1 + $0x14c8] sm:$0xff] }
  0x5f   :  { %1004 = vmatprep.subr.mxu0 %v546_v57  ;;  %1075 = vmatprep.subr.mxu1 %v36_v58  ;;  %v172_v57 = vld [vmem:[%s4252_s1 + $0x4d8] sm:$0xff]  ;;  %v681_v58 = vld [vmem:[%s4252_s1 + $0x14c0] sm:$0xff] }
  0x60   :  { %1005 = vmatpush1.msra.mxu0 %v545_v59  ;;  %1076 = vmatpush1.msra.mxu1 %v35_v60  ;;  %v171_v59 = vld [vmem:[%s4252_s1 + $0x4d0] sm:$0xff]  ;;  %v674_v60 = vld [vmem:[%s4252_s1 + $0x1488] sm:$0xff] }
  0x61   :  { %1006 = vmatprep.subr.mxu0 %v538_v61  ;;  %1077 = vmatprep.subr.mxu1 %v28_v62  ;;  %v164_v61 = vld [vmem:[%s4252_s1 + $0x498] sm:$0xff]  ;;  %v673_v62 = vld [vmem:[%s4252_s1 + $0x1480] sm:$0xff] }
  0x62   :  { %1007 = vmatpush1.msra.mxu0 %v537_v63  ;;  %1078 = vmatpush1.msra.mxu1 %v27_v1  ;;  %v163_v63 = vld [vmem:[%s4252_s1 + $0x490] sm:$0xff] }
  0x63   :  { %1008 = vmatprep.subr.mxu0 %v530_v2  ;;  %1079 = vmatprep.subr.mxu1 %v20_v4  ;;  %v2607_v1 = vld [vmem:[%s4253_s0 + $0x10] sm:$0xff]  ;;  %v666_v2 = vld [vmem:[%s4252_s1 + $0x1448] sm:$0xff]  ;;  %v156_v4 = vld [vmem:[%s4252_s1 + $0x458] sm:$0xff] }
  0x64   :  { %1009 = vmatpush1.msra.mxu0 %v529_v5  ;;  %1080 = vmatpush1.msra.mxu1 %v19_v6  ;;  %v665_v5 = vld [vmem:[%s4252_s1 + $0x1440] sm:$0xff]  ;;  %v155_v6 = vld [vmem:[%s4252_s1 + $0x450] sm:$0xff] }
  0x65   :  { %1010 = vmatprep.subr.mxu0 %v778_v7  ;;  %1081 = vmatprep.subr.mxu1 %v268_v8  ;;  %v658_v7 = vld [vmem:[%s4252_s1 + $0x1408] sm:$0xff]  ;;  %v148_v8 = vld [vmem:[%s4252_s1 + $0x418] sm:$0xff] }
  0x66   :  { %1011 = vmatpush2.msra.mxu0 %v777_v9  ;;  %1082 = vmatpush2.msra.mxu1 %v267_v10  ;;  %v2629_v9 = vcombine.high %v2607_v1, %v2607_v1  ;;  %v657_v10 = vld [vmem:[%s4252_s1 + $0x1400] sm:$0xff] }
  0x67   :  { %1012 = vmatprep.subr.mxu0 %v770_v11  ;;  %1083 = vmatprep.subr.mxu1 %v260_v12  ;;  %v147_v11 = vld [vmem:[%s4252_s1 + $0x410] sm:$0xff]  ;;  %v396_v12 = vld [vmem:[%s4252_s1 + $0xbd8] sm:$0xff] }
  0x68   :  { %1013 = vmatpush2.msra.mxu0 %v769_v13  ;;  %1084 = vmatpush2.msra.mxu1 %v259_v14  ;;  %v652_v13 = vld [vmem:[%s4252_s1 + $0x13d8] sm:$0xff]  ;;  %v395_v14 = vld [vmem:[%s4252_s1 + $0xbd0] sm:$0xff] }
  0x69   :  { %1014 = vmatprep.subr.mxu0 %v762_v15  ;;  %1085 = vmatprep.subr.mxu1 %v252_v16  ;;  %v651_v15 = vld [vmem:[%s4252_s1 + $0x13d0] sm:$0xff]  ;;  %v388_v16 = vld [vmem:[%s4252_s1 + $0xb98] sm:$0xff] }
  0x6a   :  { %1015 = vmatpush2.msra.mxu0 %v761_v17  ;;  %1086 = vmatpush2.msra.mxu1 %v251_v18  ;;  %v644_v17 = vld [vmem:[%s4252_s1 + $0x1398] sm:$0xff]  ;;  %v387_v18 = vld [vmem:[%s4252_s1 + $0xb90] sm:$0xff] }
  0x6b   :  { %1016 = vmatprep.subr.mxu0 %v754_v19  ;;  %1087 = vmatprep.subr.mxu1 %v244_v20  ;;  %v643_v19 = vld [vmem:[%s4252_s1 + $0x1390] sm:$0xff]  ;;  %v380_v20 = vld [vmem:[%s4252_s1 + $0xb58] sm:$0xff] }
  0x6c   :  { %1017 = vmatpush2.msra.mxu0 %v753_v21  ;;  %1088 = vmatpush2.msra.mxu1 %v243_v22  ;;  %v636_v21 = vld [vmem:[%s4252_s1 + $0x1358] sm:$0xff]  ;;  %v635_v22 = vld [vmem:[%s4252_s1 + $0x1350] sm:$0xff] }
  0x6d   :  { %1018 = vmatprep.subr.mxu0 %v746_v23  ;;  %1089 = vmatprep.subr.mxu1 %v236_v24  ;;  %v372_v23 = vld [vmem:[%s4252_s1 + $0xb18] sm:$0xff] }
  0x6e   :  { %1019 = vmatpush2.msra.mxu0 %v745_v25  ;;  %1090 = vmatpush2.msra.mxu1 %v235_v26  ;;  %v628_v24 = vld [vmem:[%s4252_s1 + $0x1318] sm:$0xff]  ;;  %v371_v25 = vld [vmem:[%s4252_s1 + $0xb10] sm:$0xff] }
  0x6f   :  { %1020 = vmatprep.subr.mxu0 %v738_v27  ;;  %1091 = vmatprep.subr.mxu1 %v228_v28  ;;  %v627_v26 = vld [vmem:[%s4252_s1 + $0x1310] sm:$0xff]  ;;  %v364_v27 = vld [vmem:[%s4252_s1 + $0xad8] sm:$0xff] }
  0x70   :  { %1021 = vmatpush2.msra.mxu0 %v737_v29  ;;  %1092 = vmatpush2.msra.mxu1 %v227_v30  ;;  %v620_v28 = vld [vmem:[%s4252_s1 + $0x12d8] sm:$0xff]  ;;  %v363_v29 = vld [vmem:[%s4252_s1 + $0xad0] sm:$0xff] }
  0x71   :  { %1022 = vmatprep.subr.mxu0 %v730_v31  ;;  %1093 = vmatprep.subr.mxu1 %v220_v32  ;;  %v619_v30 = vld [vmem:[%s4252_s1 + $0x12d0] sm:$0xff]  ;;  %v356_v31 = vld [vmem:[%s4252_s1 + $0xa98] sm:$0xff] }
  0x72   :  { %1023 = vmatpush2.msra.mxu0 %v729_v33  ;;  %1094 = vmatpush2.msra.mxu1 %v219_v34  ;;  %v612_v32 = vld [vmem:[%s4252_s1 + $0x1298] sm:$0xff]  ;;  %v355_v33 = vld [vmem:[%s4252_s1 + $0xa90] sm:$0xff] }
  0x73   :  { %1024 = vmatprep.subr.mxu0 %v722_v35  ;;  %1095 = vmatprep.subr.mxu1 %v212_v36  ;;  %v611_v34 = vld [vmem:[%s4252_s1 + $0x1290] sm:$0xff]  ;;  %v348_v35 = vld [vmem:[%s4252_s1 + $0xa58] sm:$0xff] }
  0x74   :  { %1025 = vmatpush2.msra.mxu0 %v721_v37  ;;  %1096 = vmatpush2.msra.mxu1 %v211_v38  ;;  %v604_v36 = vld [vmem:[%s4252_s1 + $0x1258] sm:$0xff]  ;;  %v347_v37 = vld [vmem:[%s4252_s1 + $0xa50] sm:$0xff] }
  0x75   :  { %1026 = vmatprep.subr.mxu0 %v714_v39  ;;  %1097 = vmatprep.subr.mxu1 %v204_v40  ;;  %v603_v38 = vld [vmem:[%s4252_s1 + $0x1250] sm:$0xff]  ;;  %v340_v39 = vld [vmem:[%s4252_s1 + $0xa18] sm:$0xff] }
  0x76   :  { %1027 = vmatpush2.msra.mxu0 %v713_v41  ;;  %1098 = vmatpush2.msra.mxu1 %v203_v42  ;;  %v596_v40 = vld [vmem:[%s4252_s1 + $0x1218] sm:$0xff]  ;;  %v339_v41 = vld [vmem:[%s4252_s1 + $0xa10] sm:$0xff] }
  0x77   :  { %1028 = vmatprep.subr.mxu0 %v706_v43  ;;  %1099 = vmatprep.subr.mxu1 %v196_v44  ;;  %v595_v42 = vld [vmem:[%s4252_s1 + $0x1210] sm:$0xff]  ;;  %v332_v43 = vld [vmem:[%s4252_s1 + $0x9d8] sm:$0xff] }
  0x78   :  { %1029 = vmatpush2.msra.mxu0 %v705_v45  ;;  %1100 = vmatpush2.msra.mxu1 %v195_v46  ;;  %v588_v44 = vld [vmem:[%s4252_s1 + $0x11d8] sm:$0xff]  ;;  %v331_v45 = vld [vmem:[%s4252_s1 + $0x9d0] sm:$0xff] }
  0x79   :  { %1030 = vmatprep.subr.mxu0 %v698_v47  ;;  %1101 = vmatprep.subr.mxu1 %v188_v48  ;;  %v587_v46 = vld [vmem:[%s4252_s1 + $0x11d0] sm:$0xff]  ;;  %v324_v47 = vld [vmem:[%s4252_s1 + $0x998] sm:$0xff] }
  0x7a   :  { %1031 = vmatpush2.msra.mxu0 %v697_v49  ;;  %1102 = vmatpush2.msra.mxu1 %v187_v50  ;;  %v580_v48 = vld [vmem:[%s4252_s1 + $0x1198] sm:$0xff]  ;;  %v323_v49 = vld [vmem:[%s4252_s1 + $0x990] sm:$0xff] }
  0x7b   :  { %1032 = vmatprep.subr.mxu0 %v690_v51  ;;  %1103 = vmatprep.subr.mxu1 %v180_v52  ;;  %v579_v50 = vld [vmem:[%s4252_s1 + $0x1190] sm:$0xff]  ;;  %v316_v51 = vld [vmem:[%s4252_s1 + $0x958] sm:$0xff] }
  0x7c   :  { %1033 = vmatpush2.msra.mxu0 %v689_v53  ;;  %1104 = vmatpush2.msra.mxu1 %v179_v54  ;;  %v572_v52 = vld [vmem:[%s4252_s1 + $0x1158] sm:$0xff]  ;;  %v315_v53 = vld [vmem:[%s4252_s1 + $0x950] sm:$0xff] }
  0x7d   :  { %1034 = vmatprep.subr.mxu0 %v682_v55  ;;  %1105 = vmatprep.subr.mxu1 %v172_v57  ;;  %v571_v54 = vld [vmem:[%s4252_s1 + $0x1150] sm:$0xff]  ;;  %v308_v55 = vld [vmem:[%s4252_s1 + $0x918] sm:$0xff] }
  0x7e   :  { %1035 = vmatpush2.msra.mxu0 %v681_v58  ;;  %1106 = vmatpush2.msra.mxu1 %v171_v59  ;;  %v564_v57 = vld [vmem:[%s4252_s1 + $0x1118] sm:$0xff]  ;;  %v307_v58 = vld [vmem:[%s4252_s1 + $0x910] sm:$0xff] }
  0x7f   :  { %1036 = vmatprep.subr.mxu0 %v674_v60  ;;  %1107 = vmatprep.subr.mxu1 %v164_v61  ;;  %v563_v59 = vld [vmem:[%s4252_s1 + $0x1110] sm:$0xff]  ;;  %v300_v60 = vld [vmem:[%s4252_s1 + $0x8d8] sm:$0xff] }
  0x80   :  { %1037 = vmatpush2.msra.mxu0 %v673_v62  ;;  %1108 = vmatpush2.msra.mxu1 %v163_v63  ;;  %v556_v61 = vld [vmem:[%s4252_s1 + $0x10d8] sm:$0xff]  ;;  %v299_v62 = vld [vmem:[%s4252_s1 + $0x8d0] sm:$0xff] }
  0x81   :  { %1038 = vmatprep.subr.mxu0 %v666_v2  ;;  %1109 = vmatprep.subr.mxu1 %v156_v4  ;;  %v555_v63 = vld [vmem:[%s4252_s1 + $0x10d0] sm:$0xff]  ;;  %v292_v2 = vld [vmem:[%s4252_s1 + $0x898] sm:$0xff] }
  0x82   :  { %1039 = vmatpush2.msra.mxu0 %v665_v5  ;;  %1110 = vmatpush2.msra.mxu1 %v155_v6  ;;  %v548_v4 = vld [vmem:[%s4252_s1 + $0x1098] sm:$0xff]  ;;  %v291_v5 = vld [vmem:[%s4252_s1 + $0x890] sm:$0xff] }
  0x83   :  { %1040 = vmatprep.subr.mxu0 %v658_v7  ;;  %1111 = vmatprep.subr.mxu1 %v148_v8  ;;  %v547_v6 = vld [vmem:[%s4252_s1 + $0x1090] sm:$0xff]  ;;  %v284_v7 = vld [vmem:[%s4252_s1 + $0x858] sm:$0xff] }
  0x84   :  { %1041 = vmatpush2.msra.mxu0 %v657_v10  ;;  %1042 = vmatprep.mubr.f32.mxu0 %v2629_v9  ;;  %v540_v8 = vld [vmem:[%s4252_s1 + $0x1058] sm:$0xff]  ;;  %v283_v10 = vld [vmem:[%s4252_s1 + $0x850] sm:$0xff] }
  0x85   :  { %1112 = vmatpush2.msra.mxu1 %v147_v11  ;;  %1043 = vmatmul.mubr.f32.vlgmr.msra.gmra.mxu0 %v2607_v1  ;;  %v539_v11 = vld [vmem:[%s4252_s1 + $0x1050] sm:$0xff] }
  0x86   :  { %1113 = vmatprep.mubr.f32.mxu1 %v2231_v0  ;;  %1120 = vmatprep.subr.mxu0 %v396_v12  ;;  %v276_v12 = vld [vmem:[%s4252_s1 + $0x818] sm:$0xff] }
  0x87   :  { %1191 = vmatprep.subr.mxu1 %v652_v13  ;;  %1114 = vmatmul.mubr.f32.vlgmr.msra.gmra.mxu1 %v2206_v56  ;;  %v379_v56 = vld [vmem:[%s4252_s1 + $0xb50] sm:$0xff]  ;;  %v532_v13 = vld [vmem:[%s4252_s1 + $0x1018] sm:$0xff] }
  0x88   :  { %1121 = vmatpush1.msra.mxu0 %v395_v14  ;;  %1192 = vmatpush1.msra.mxu1 %v651_v15  ;;  %v275_v14 = vld [vmem:[%s4252_s1 + $0x810] sm:$0xff] }
  0x89   :  { %1122 = vmatprep.subr.mxu0 %v388_v16  ;;  %1193 = vmatprep.subr.mxu1 %v644_v17  ;;  %v531_v15 = vld [vmem:[%s4252_s1 + $0x1010] sm:$0xff]  ;;  %v524_v16 = vld [vmem:[%s4252_s1 + $0xfd8] sm:$0xff] }
  0x8a   :  { %1123 = vmatpush1.msra.mxu0 %v387_v18  ;;  %1194 = vmatpush1.msra.mxu1 %v643_v19  ;;  %v780_v17 = vld [vmem:[%s4252_s1 + $0x17d8] sm:$0xff]  ;;  %v523_v18 = vld [vmem:[%s4252_s1 + $0xfd0] sm:$0xff] }
  0x8b   :  { %1124 = vmatprep.subr.mxu0 %v380_v20  ;;  %1195 = vmatprep.subr.mxu1 %v636_v21  ;;  %v779_v19 = vld [vmem:[%s4252_s1 + $0x17d0] sm:$0xff]  ;;  %v516_v20 = vld [vmem:[%s4252_s1 + $0xf98] sm:$0xff] }
  0x8c   :  { %1125 = vmatpush1.msra.mxu0 %v379_v56  ;;  %1196 = vmatpush1.msra.mxu1 %v635_v22  ;;  %v772_v21 = vld [vmem:[%s4252_s1 + $0x1798] sm:$0xff]  ;;  %v515_v56 = vld [vmem:[%s4252_s1 + $0xf90] sm:$0xff] }
  0x8d   :  { %1126 = vmatprep.subr.mxu0 %v372_v23  ;;  %1197 = vmatprep.subr.mxu1 %v628_v24  ;;  %v771_v22 = vld [vmem:[%s4252_s1 + $0x1790] sm:$0xff]  ;;  %v508_v23 = vld [vmem:[%s4252_s1 + $0xf58] sm:$0xff] }
  0x8e   :  { %1127 = vmatpush1.msra.mxu0 %v371_v25  ;;  %1198 = vmatpush1.msra.mxu1 %v627_v26  ;;  %v764_v24 = vld [vmem:[%s4252_s1 + $0x1758] sm:$0xff]  ;;  %v507_v25 = vld [vmem:[%s4252_s1 + $0xf50] sm:$0xff] }
  0x8f   :  { %1128 = vmatprep.subr.mxu0 %v364_v27  ;;  %1199 = vmatprep.subr.mxu1 %v620_v28  ;;  %v763_v26 = vld [vmem:[%s4252_s1 + $0x1750] sm:$0xff]  ;;  %v500_v27 = vld [vmem:[%s4252_s1 + $0xf18] sm:$0xff] }
  0x90   :  { %1129 = vmatpush1.msra.mxu0 %v363_v29  ;;  %1200 = vmatpush1.msra.mxu1 %v619_v30  ;;  %v756_v28 = vld [vmem:[%s4252_s1 + $0x1718] sm:$0xff]  ;;  %v499_v29 = vld [vmem:[%s4252_s1 + $0xf10] sm:$0xff] }
  0x91   :  { %1130 = vmatprep.subr.mxu0 %v356_v31  ;;  %1201 = vmatprep.subr.mxu1 %v612_v32  ;;  %v755_v30 = vld [vmem:[%s4252_s1 + $0x1710] sm:$0xff]  ;;  %v492_v31 = vld [vmem:[%s4252_s1 + $0xed8] sm:$0xff] }
  0x92   :  { %1131 = vmatpush1.msra.mxu0 %v355_v33  ;;  %1202 = vmatpush1.msra.mxu1 %v611_v34  ;;  %v748_v32 = vld [vmem:[%s4252_s1 + $0x16d8] sm:$0xff]  ;;  %v491_v33 = vld [vmem:[%s4252_s1 + $0xed0] sm:$0xff] }
  0x93   :  { %1132 = vmatprep.subr.mxu0 %v348_v35  ;;  %1203 = vmatprep.subr.mxu1 %v604_v36  ;;  %v747_v34 = vld [vmem:[%s4252_s1 + $0x16d0] sm:$0xff]  ;;  %v484_v35 = vld [vmem:[%s4252_s1 + $0xe98] sm:$0xff] }
  0x94   :  { %1133 = vmatpush1.msra.mxu0 %v347_v37  ;;  %1204 = vmatpush1.msra.mxu1 %v603_v38  ;;  %v740_v36 = vld [vmem:[%s4252_s1 + $0x1698] sm:$0xff]  ;;  %v483_v37 = vld [vmem:[%s4252_s1 + $0xe90] sm:$0xff] }
  0x95   :  { %1134 = vmatprep.subr.mxu0 %v340_v39  ;;  %1205 = vmatprep.subr.mxu1 %v596_v40  ;;  %v739_v38 = vld [vmem:[%s4252_s1 + $0x1690] sm:$0xff]  ;;  %v476_v39 = vld [vmem:[%s4252_s1 + $0xe58] sm:$0xff] }
  0x96   :  { %1135 = vmatpush1.msra.mxu0 %v339_v41  ;;  %1206 = vmatpush1.msra.mxu1 %v595_v42  ;;  %v732_v40 = vld [vmem:[%s4252_s1 + $0x1658] sm:$0xff]  ;;  %v475_v41 = vld [vmem:[%s4252_s1 + $0xe50] sm:$0xff] }
  0x97   :  { %1136 = vmatprep.subr.mxu0 %v332_v43  ;;  %1207 = vmatprep.subr.mxu1 %v588_v44  ;;  %v731_v42 = vld [vmem:[%s4252_s1 + $0x1650] sm:$0xff]  ;;  %v468_v43 = vld [vmem:[%s4252_s1 + $0xe18] sm:$0xff] }
  0x98   :  { %1137 = vmatpush1.msra.mxu0 %v331_v45  ;;  %1208 = vmatpush1.msra.mxu1 %v587_v46  ;;  %v724_v44 = vld [vmem:[%s4252_s1 + $0x1618] sm:$0xff]  ;;  %v467_v45 = vld [vmem:[%s4252_s1 + $0xe10] sm:$0xff] }
  0x99   :  { %1138 = vmatprep.subr.mxu0 %v324_v47  ;;  %1209 = vmatprep.subr.mxu1 %v580_v48  ;;  %v723_v46 = vld [vmem:[%s4252_s1 + $0x1610] sm:$0xff]  ;;  %v460_v47 = vld [vmem:[%s4252_s1 + $0xdd8] sm:$0xff] }
  0x9a   :  { %1139 = vmatpush1.msra.mxu0 %v323_v49  ;;  %1210 = vmatpush1.msra.mxu1 %v579_v50  ;;  %v716_v48 = vld [vmem:[%s4252_s1 + $0x15d8] sm:$0xff]  ;;  %v459_v49 = vld [vmem:[%s4252_s1 + $0xdd0] sm:$0xff] }
  0x9b   :  { %1140 = vmatprep.subr.mxu0 %v316_v51  ;;  %1211 = vmatprep.subr.mxu1 %v572_v52  ;;  %v715_v50 = vld [vmem:[%s4252_s1 + $0x15d0] sm:$0xff]  ;;  %v452_v51 = vld [vmem:[%s4252_s1 + $0xd98] sm:$0xff] }
  0x9c   :  { %1141 = vmatpush1.msra.mxu0 %v315_v53  ;;  %1212 = vmatpush1.msra.mxu1 %v571_v54  ;;  %v708_v52 = vld [vmem:[%s4252_s1 + $0x1598] sm:$0xff]  ;;  %v451_v53 = vld [vmem:[%s4252_s1 + $0xd90] sm:$0xff] }
  0x9d   :  { %1142 = vmatprep.subr.mxu0 %v308_v55  ;;  %1213 = vmatprep.subr.mxu1 %v564_v57  ;;  %v707_v54 = vld [vmem:[%s4252_s1 + $0x1590] sm:$0xff]  ;;  %v444_v55 = vld [vmem:[%s4252_s1 + $0xd58] sm:$0xff] }
  0x9e   :  { %1143 = vmatpush1.msra.mxu0 %v307_v58  ;;  %1214 = vmatpush1.msra.mxu1 %v563_v59  ;;  %v700_v57 = vld [vmem:[%s4252_s1 + $0x1558] sm:$0xff]  ;;  %v443_v58 = vld [vmem:[%s4252_s1 + $0xd50] sm:$0xff] }
  0x9f   :  { %1144 = vmatprep.subr.mxu0 %v300_v60  ;;  %1215 = vmatprep.subr.mxu1 %v556_v61  ;;  %v699_v59 = vld [vmem:[%s4252_s1 + $0x1550] sm:$0xff]  ;;  %v436_v60 = vld [vmem:[%s4252_s1 + $0xd18] sm:$0xff] }
  0xa0   :  { %1145 = vmatpush1.msra.mxu0 %v299_v62  ;;  %1216 = vmatpush1.msra.mxu1 %v555_v63  ;;  %v692_v61 = vld [vmem:[%s4252_s1 + $0x1518] sm:$0xff]  ;;  %v435_v62 = vld [vmem:[%s4252_s1 + $0xd10] sm:$0xff] }
  0xa1   :  { %1146 = vmatprep.subr.mxu0 %v292_v2  ;;  %1217 = vmatprep.subr.mxu1 %v548_v4  ;;  %v691_v63 = vld [vmem:[%s4252_s1 + $0x1510] sm:$0xff]  ;;  %v428_v2 = vld [vmem:[%s4252_s1 + $0xcd8] sm:$0xff] }
  0xa2   :  { %1147 = vmatpush1.msra.mxu0 %v291_v5  ;;  %1218 = vmatpush1.msra.mxu1 %v547_v6  ;;  %v684_v4 = vld [vmem:[%s4252_s1 + $0x14d8] sm:$0xff]  ;;  %v427_v5 = vld [vmem:[%s4252_s1 + $0xcd0] sm:$0xff] }
  0xa3   :  { %1148 = vmatprep.subr.mxu0 %v284_v7  ;;  %1219 = vmatprep.subr.mxu1 %v540_v8  ;;  %v683_v6 = vld [vmem:[%s4252_s1 + $0x14d0] sm:$0xff]  ;;  %v420_v7 = vld [vmem:[%s4252_s1 + $0xc98] sm:$0xff] }
  0xa4   :  { %1149 = vmatpush1.msra.mxu0 %v283_v10  ;;  %1220 = vmatpush1.msra.mxu1 %v539_v11  ;;  %v676_v8 = vld [vmem:[%s4252_s1 + $0x1498] sm:$0xff]  ;;  %v419_v10 = vld [vmem:[%s4252_s1 + $0xc90] sm:$0xff] }
  0xa5   :  { %1150 = vmatprep.subr.mxu0 %v276_v12  ;;  %1221 = vmatprep.subr.mxu1 %v532_v13  ;;  %v675_v11 = vld [vmem:[%s4252_s1 + $0x1490] sm:$0xff]  ;;  %v412_v12 = vld [vmem:[%s4252_s1 + $0xc58] sm:$0xff] }
  0xa6   :  { %1151 = vmatpush1.msra.mxu0 %v275_v14  ;;  %1222 = vmatpush1.msra.mxu1 %v531_v15  ;;  %v668_v13 = vld [vmem:[%s4252_s1 + $0x1458] sm:$0xff]  ;;  %v411_v14 = vld [vmem:[%s4252_s1 + $0xc50] sm:$0xff] }
  0xa7   :  { %1152 = vmatprep.subr.mxu0 %v524_v16  ;;  %1223 = vmatprep.subr.mxu1 %v780_v17  ;;  %v667_v15 = vld [vmem:[%s4252_s1 + $0x1450] sm:$0xff]  ;;  %v404_v16 = vld [vmem:[%s4252_s1 + $0xc18] sm:$0xff] }
  0xa8   :  { %1153 = vmatpush2.msra.mxu0 %v523_v18  ;;  %1224 = vmatpush2.msra.mxu1 %v779_v19  ;;  %v660_v17 = vld [vmem:[%s4252_s1 + $0x1418] sm:$0xff]  ;;  %v403_v18 = vld [vmem:[%s4252_s1 + $0xc10] sm:$0xff] }
  0xa9   :  { %1154 = vmatprep.subr.mxu0 %v516_v20  ;;  %1225 = vmatprep.subr.mxu1 %v772_v21  ;;  %v659_v19 = vld [vmem:[%s4252_s1 + $0x1410] sm:$0xff]  ;;  %v142_v20 = vld [vmem:[%s4252_s1 + $0x3e8] sm:$0xff] }
  0xaa   :  { %1155 = vmatpush2.msra.mxu0 %v515_v56  ;;  %1226 = vmatpush2.msra.mxu1 %v771_v22  ;;  %v398_v21 = vld [vmem:[%s4252_s1 + $0xbe8] sm:$0xff]  ;;  %v141_v22 = vld [vmem:[%s4252_s1 + $0x3e0] sm:$0xff] }
  0xab   :  { %1156 = vmatprep.subr.mxu0 %v508_v23  ;;  %1227 = vmatprep.subr.mxu1 %v764_v24  ;;  %v3035_v56 = vld [vmem:[%s4253_s0 + $0x8] sm:$0xff]  ;;  %v397_v23 = vld [vmem:[%s4252_s1 + $0xbe0] sm:$0xff] }
  0xac   :  { %1157 = vmatpush2.msra.mxu0 %v507_v25  ;;  %1228 = vmatpush2.msra.mxu1 %v763_v26  ;;  %v134_v24 = vld [vmem:[%s4252_s1 + $0x3a8] sm:$0xff]  ;;  %v133_v26 = vld [vmem:[%s4252_s1 + $0x3a0] sm:$0xff] }
  0xad   :  { %1158 = vmatprep.subr.mxu0 %v500_v27  ;;  %1229 = vmatprep.subr.mxu1 %v756_v28  ;;  %v390_v25 = vld [vmem:[%s4252_s1 + $0xba8] sm:$0xff]  ;;  %v389_v27 = vld [vmem:[%s4252_s1 + $0xba0] sm:$0xff] }
  0xae   :  { %1159 = vmatpush2.msra.mxu0 %v499_v29  ;;  %1230 = vmatpush2.msra.mxu1 %v755_v30  ;;  %v126_v28 = vld [vmem:[%s4252_s1 + $0x368] sm:$0xff]  ;;  %v381_v30 = vld [vmem:[%s4252_s1 + $0xb60] sm:$0xff] }
  0xaf   :  { %1160 = vmatprep.subr.mxu0 %v492_v31  ;;  %1231 = vmatprep.subr.mxu1 %v748_v32  ;;  %v382_v29 = vld [vmem:[%s4252_s1 + $0xb68] sm:$0xff] }
  0xb0   :  { %1161 = vmatpush2.msra.mxu0 %v491_v33  ;;  %1232 = vmatpush2.msra.mxu1 %v747_v34  ;;  %v118_v31 = vld [vmem:[%s4252_s1 + $0x328] sm:$0xff]  ;;  %v117_v33 = vld [vmem:[%s4252_s1 + $0x320] sm:$0xff] }
  0xb1   :  { %1162 = vmatprep.subr.mxu0 %v484_v35  ;;  %1233 = vmatprep.subr.mxu1 %v740_v36  ;;  %v374_v32 = vld [vmem:[%s4252_s1 + $0xb28] sm:$0xff]  ;;  %v373_v34 = vld [vmem:[%s4252_s1 + $0xb20] sm:$0xff] }
  0xb2   :  { %1163 = vmatpush2.msra.mxu0 %v483_v37  ;;  %1234 = vmatpush2.msra.mxu1 %v739_v38  ;;  %v110_v35 = vld [vmem:[%s4252_s1 + $0x2e8] sm:$0xff]  ;;  %v109_v37 = vld [vmem:[%s4252_s1 + $0x2e0] sm:$0xff] }
  0xb3   :  { %1164 = vmatprep.subr.mxu0 %v476_v39  ;;  %1235 = vmatprep.subr.mxu1 %v732_v40  ;;  %v366_v36 = vld [vmem:[%s4252_s1 + $0xae8] sm:$0xff]  ;;  %v365_v38 = vld [vmem:[%s4252_s1 + $0xae0] sm:$0xff] }
  0xb4   :  { %1165 = vmatpush2.msra.mxu0 %v475_v41  ;;  %1236 = vmatpush2.msra.mxu1 %v731_v42  ;;  %v102_v39 = vld [vmem:[%s4252_s1 + $0x2a8] sm:$0xff]  ;;  %v101_v41 = vld [vmem:[%s4252_s1 + $0x2a0] sm:$0xff] }
  0xb5   :  { %1166 = vmatprep.subr.mxu0 %v468_v43  ;;  %1237 = vmatprep.subr.mxu1 %v724_v44  ;;  %v358_v40 = vld [vmem:[%s4252_s1 + $0xaa8] sm:$0xff]  ;;  %v357_v42 = vld [vmem:[%s4252_s1 + $0xaa0] sm:$0xff] }
  0xb6   :  { %1167 = vmatpush2.msra.mxu0 %v467_v45  ;;  %1238 = vmatpush2.msra.mxu1 %v723_v46  ;;  %v94_v43 = vld [vmem:[%s4252_s1 + $0x268] sm:$0xff]  ;;  %v93_v45 = vld [vmem:[%s4252_s1 + $0x260] sm:$0xff] }
  0xb7   :  { %1168 = vmatprep.subr.mxu0 %v460_v47  ;;  %1239 = vmatprep.subr.mxu1 %v716_v48  ;;  %v350_v44 = vld [vmem:[%s4252_s1 + $0xa68] sm:$0xff]  ;;  %v349_v46 = vld [vmem:[%s4252_s1 + $0xa60] sm:$0xff] }
  0xb8   :  { %1169 = vmatpush2.msra.mxu0 %v459_v49  ;;  %1240 = vmatpush2.msra.mxu1 %v715_v50  ;;  %v86_v47 = vld [vmem:[%s4252_s1 + $0x228] sm:$0xff]  ;;  %v85_v49 = vld [vmem:[%s4252_s1 + $0x220] sm:$0xff] }
  0xb9   :  { %1170 = vmatprep.subr.mxu0 %v452_v51  ;;  %1241 = vmatprep.subr.mxu1 %v708_v52  ;;  %v342_v48 = vld [vmem:[%s4252_s1 + $0xa28] sm:$0xff]  ;;  %v341_v50 = vld [vmem:[%s4252_s1 + $0xa20] sm:$0xff] }
  0xba   :  { %1171 = vmatpush2.msra.mxu0 %v451_v53  ;;  %1242 = vmatpush2.msra.mxu1 %v707_v54  ;;  %v78_v51 = vld [vmem:[%s4252_s1 + $0x1e8] sm:$0xff]  ;;  %v77_v53 = vld [vmem:[%s4252_s1 + $0x1e0] sm:$0xff] }
  0xbb   :  { %1172 = vmatprep.subr.mxu0 %v444_v55  ;;  %1243 = vmatprep.subr.mxu1 %v700_v57  ;;  %v334_v52 = vld [vmem:[%s4252_s1 + $0x9e8] sm:$0xff]  ;;  %v333_v54 = vld [vmem:[%s4252_s1 + $0x9e0] sm:$0xff] }
  0xbc   :  { %1173 = vmatpush2.msra.mxu0 %v443_v58  ;;  %1244 = vmatpush2.msra.mxu1 %v699_v59  ;;  %v70_v55 = vld [vmem:[%s4252_s1 + $0x1a8] sm:$0xff]  ;;  %v69_v58 = vld [vmem:[%s4252_s1 + $0x1a0] sm:$0xff] }
  0xbd   :  { %1174 = vmatprep.subr.mxu0 %v436_v60  ;;  %1245 = vmatprep.subr.mxu1 %v692_v61  ;;  %v326_v57 = vld [vmem:[%s4252_s1 + $0x9a8] sm:$0xff]  ;;  %v325_v59 = vld [vmem:[%s4252_s1 + $0x9a0] sm:$0xff] }
  0xbe   :  { %1175 = vmatpush2.msra.mxu0 %v435_v62  ;;  %1246 = vmatpush2.msra.mxu1 %v691_v63  ;;  %v62_v60 = vld [vmem:[%s4252_s1 + $0x168] sm:$0xff]  ;;  %v61_v62 = vld [vmem:[%s4252_s1 + $0x160] sm:$0xff] }
  0xbf   :  { %1176 = vmatprep.subr.mxu0 %v428_v2  ;;  %1247 = vmatprep.subr.mxu1 %v684_v4  ;;  %v318_v61 = vld [vmem:[%s4252_s1 + $0x968] sm:$0xff]  ;;  %v317_v63 = vld [vmem:[%s4252_s1 + $0x960] sm:$0xff] }
  0xc0   :  { %1177 = vmatpush2.msra.mxu0 %v427_v5  ;;  %1248 = vmatpush2.msra.mxu1 %v683_v6  ;;  %v54_v2 = vld [vmem:[%s4252_s1 + $0x128] sm:$0xff]  ;;  %v53_v5 = vld [vmem:[%s4252_s1 + $0x120] sm:$0xff] }
  0xc1   :  { %1178 = vmatprep.subr.mxu0 %v420_v7  ;;  %1249 = vmatprep.subr.mxu1 %v676_v8  ;;  %v310_v4 = vld [vmem:[%s4252_s1 + $0x928] sm:$0xff]  ;;  %v309_v6 = vld [vmem:[%s4252_s1 + $0x920] sm:$0xff] }
  0xc2   :  { %1179 = vmatpush2.msra.mxu0 %v419_v10  ;;  %1250 = vmatpush2.msra.mxu1 %v675_v11  ;;  %v46_v7 = vld [vmem:[%s4252_s1 + $0xe8] sm:$0xff]  ;;  %v45_v10 = vld [vmem:[%s4252_s1 + $0xe0] sm:$0xff] }
  0xc3   :  { %1180 = vmatprep.subr.mxu0 %v412_v12  ;;  %1251 = vmatprep.subr.mxu1 %v668_v13  ;;  %v302_v8 = vld [vmem:[%s4252_s1 + $0x8e8] sm:$0xff]  ;;  %v301_v11 = vld [vmem:[%s4252_s1 + $0x8e0] sm:$0xff] }
  0xc4   :  { %1181 = vmatpush2.msra.mxu0 %v411_v14  ;;  %1252 = vmatpush2.msra.mxu1 %v667_v15  ;;  %v38_v12 = vld [vmem:[%s4252_s1 + $0xa8] sm:$0xff]  ;;  %v37_v14 = vld [vmem:[%s4252_s1 + $0xa0] sm:$0xff] }
  0xc5   :  { %1182 = vmatprep.subr.mxu0 %v404_v16  ;;  %1253 = vmatprep.subr.mxu1 %v660_v17  ;;  %v294_v13 = vld [vmem:[%s4252_s1 + $0x8a8] sm:$0xff]  ;;  %v293_v15 = vld [vmem:[%s4252_s1 + $0x8a0] sm:$0xff] }
  0xc6   :  { %1183 = vmatpush2.msra.mxu0 %v403_v18  ;;  %1184 = vmatprep.mubr.f32.mxu0 %v2239_v3  ;;  %v30_v16 = vld [vmem:[%s4252_s1 + $0x68] sm:$0xff]  ;;  %v29_v18 = vld [vmem:[%s4252_s1 + $0x60] sm:$0xff] }
  0xc7   :  { %1254 = vmatpush2.msra.mxu1 %v659_v19  ;;  %1185 = vmatmul.mubr.f32.vlgmr.msra.gmra.mxu0 %v3035_v56  ;;  %v286_v17 = vld [vmem:[%s4252_s1 + $0x868] sm:$0xff]  ;;  %v285_v19 = vld [vmem:[%s4252_s1 + $0x860] sm:$0xff] }
  0xc8   :  { %1255 = vmatprep.mubr.f32.mxu1 %v2629_v9  ;;  %1262 = vmatprep.subr.mxu0 %v142_v20  ;;  %v22_v20 = vld [vmem:[%s4252_s1 + $0x28] sm:$0xff] }
  0xc9   :  { %1333 = vmatprep.subr.mxu1 %v398_v21  ;;  %1256 = vmatmul.mubr.f32.vlgmr.msra.gmra.mxu1 %v2607_v1  ;;  %v125_v1 = vld [vmem:[%s4252_s1 + $0x360] sm:$0xff]  ;;  %v278_v21 = vld [vmem:[%s4252_s1 + $0x828] sm:$0xff] }
  0xca   :  { %1263 = vmatpush1.msra.mxu0 %v141_v22  ;;  %1334 = vmatpush1.msra.mxu1 %v397_v23  ;;  %v21_v22 = vld [vmem:[%s4252_s1 + $0x20] sm:$0xff] }
  0xcb   :  { %1264 = vmatprep.subr.mxu0 %v134_v24  ;;  %1335 = vmatprep.subr.mxu1 %v390_v25  ;;  %v277_v23 = vld [vmem:[%s4252_s1 + $0x820] sm:$0xff]  ;;  %v270_v24 = vld [vmem:[%s4252_s1 + $0x7e8] sm:$0xff] }
  0xcc   :  { %1265 = vmatpush1.msra.mxu0 %v133_v26  ;;  %1336 = vmatpush1.msra.mxu1 %v389_v27  ;;  %v526_v25 = vld [vmem:[%s4252_s1 + $0xfe8] sm:$0xff]  ;;  %v269_v26 = vld [vmem:[%s4252_s1 + $0x7e0] sm:$0xff] }
  0xcd   :  { %1266 = vmatprep.subr.mxu0 %v126_v28  ;;  %1337 = vmatprep.subr.mxu1 %v382_v29  ;;  %v525_v27 = vld [vmem:[%s4252_s1 + $0xfe0] sm:$0xff]  ;;  %v262_v28 = vld [vmem:[%s4252_s1 + $0x7a8] sm:$0xff] }
  0xce   :  { %1267 = vmatpush1.msra.mxu0 %v125_v1  ;;  %1338 = vmatpush1.msra.mxu1 %v381_v30  ;;  %v518_v29 = vld [vmem:[%s4252_s1 + $0xfa8] sm:$0xff]  ;;  %v261_v1 = vld [vmem:[%s4252_s1 + $0x7a0] sm:$0xff] }
  0xcf   :  { %1268 = vmatprep.subr.mxu0 %v118_v31  ;;  %1339 = vmatprep.subr.mxu1 %v374_v32  ;;  %v517_v30 = vld [vmem:[%s4252_s1 + $0xfa0] sm:$0xff]  ;;  %v254_v31 = vld [vmem:[%s4252_s1 + $0x768] sm:$0xff] }
  0xd0   :  { %1269 = vmatpush1.msra.mxu0 %v117_v33  ;;  %1340 = vmatpush1.msra.mxu1 %v373_v34  ;;  %v510_v32 = vld [vmem:[%s4252_s1 + $0xf68] sm:$0xff]  ;;  %v253_v33 = vld [vmem:[%s4252_s1 + $0x760] sm:$0xff] }
  0xd1   :  { %1270 = vmatprep.subr.mxu0 %v110_v35  ;;  %1341 = vmatprep.subr.mxu1 %v366_v36  ;;  %v509_v34 = vld [vmem:[%s4252_s1 + $0xf60] sm:$0xff]  ;;  %v246_v35 = vld [vmem:[%s4252_s1 + $0x728] sm:$0xff] }
  0xd2   :  { %1271 = vmatpush1.msra.mxu0 %v109_v37  ;;  %1342 = vmatpush1.msra.mxu1 %v365_v38  ;;  %v502_v36 = vld [vmem:[%s4252_s1 + $0xf28] sm:$0xff]  ;;  %v245_v37 = vld [vmem:[%s4252_s1 + $0x720] sm:$0xff] }
  0xd3   :  { %1272 = vmatprep.subr.mxu0 %v102_v39  ;;  %1343 = vmatprep.subr.mxu1 %v358_v40  ;;  %v501_v38 = vld [vmem:[%s4252_s1 + $0xf20] sm:$0xff]  ;;  %v238_v39 = vld [vmem:[%s4252_s1 + $0x6e8] sm:$0xff] }
  0xd4   :  { %1273 = vmatpush1.msra.mxu0 %v101_v41  ;;  %1344 = vmatpush1.msra.mxu1 %v357_v42  ;;  %v494_v40 = vld [vmem:[%s4252_s1 + $0xee8] sm:$0xff]  ;;  %v237_v41 = vld [vmem:[%s4252_s1 + $0x6e0] sm:$0xff] }
  0xd5   :  { %1274 = vmatprep.subr.mxu0 %v94_v43  ;;  %1345 = vmatprep.subr.mxu1 %v350_v44  ;;  %v493_v42 = vld [vmem:[%s4252_s1 + $0xee0] sm:$0xff]  ;;  %v230_v43 = vld [vmem:[%s4252_s1 + $0x6a8] sm:$0xff] }
  0xd6   :  { %1275 = vmatpush1.msra.mxu0 %v93_v45  ;;  %1346 = vmatpush1.msra.mxu1 %v349_v46  ;;  %v486_v44 = vld [vmem:[%s4252_s1 + $0xea8] sm:$0xff]  ;;  %v229_v45 = vld [vmem:[%s4252_s1 + $0x6a0] sm:$0xff] }
  0xd7   :  { %1276 = vmatprep.subr.mxu0 %v86_v47  ;;  %1347 = vmatprep.subr.mxu1 %v342_v48  ;;  %v485_v46 = vld [vmem:[%s4252_s1 + $0xea0] sm:$0xff]  ;;  %v222_v47 = vld [vmem:[%s4252_s1 + $0x668] sm:$0xff] }
  0xd8   :  { %1277 = vmatpush1.msra.mxu0 %v85_v49  ;;  %1348 = vmatpush1.msra.mxu1 %v341_v50  ;;  %v478_v48 = vld [vmem:[%s4252_s1 + $0xe68] sm:$0xff]  ;;  %v221_v49 = vld [vmem:[%s4252_s1 + $0x660] sm:$0xff] }
  0xd9   :  { %1278 = vmatprep.subr.mxu0 %v78_v51  ;;  %1349 = vmatprep.subr.mxu1 %v334_v52  ;;  %v477_v50 = vld [vmem:[%s4252_s1 + $0xe60] sm:$0xff]  ;;  %v214_v51 = vld [vmem:[%s4252_s1 + $0x628] sm:$0xff] }
  0xda   :  { %1279 = vmatpush1.msra.mxu0 %v77_v53  ;;  %1350 = vmatpush1.msra.mxu1 %v333_v54  ;;  %v470_v52 = vld [vmem:[%s4252_s1 + $0xe28] sm:$0xff]  ;;  %v213_v53 = vld [vmem:[%s4252_s1 + $0x620] sm:$0xff] }
  0xdb   :  { %1280 = vmatprep.subr.mxu0 %v70_v55  ;;  %1351 = vmatprep.subr.mxu1 %v326_v57  ;;  %v469_v54 = vld [vmem:[%s4252_s1 + $0xe20] sm:$0xff]  ;;  %v206_v55 = vld [vmem:[%s4252_s1 + $0x5e8] sm:$0xff] }
  0xdc   :  { %1281 = vmatpush1.msra.mxu0 %v69_v58  ;;  %1352 = vmatpush1.msra.mxu1 %v325_v59  ;;  %v462_v57 = vld [vmem:[%s4252_s1 + $0xde8] sm:$0xff]  ;;  %v205_v58 = vld [vmem:[%s4252_s1 + $0x5e0] sm:$0xff] }
  0xdd   :  { %1282 = vmatprep.subr.mxu0 %v62_v60  ;;  %1353 = vmatprep.subr.mxu1 %v318_v61  ;;  %v461_v59 = vld [vmem:[%s4252_s1 + $0xde0] sm:$0xff]  ;;  %v198_v60 = vld [vmem:[%s4252_s1 + $0x5a8] sm:$0xff] }
  0xde   :  { %1283 = vmatpush1.msra.mxu0 %v61_v62  ;;  %1354 = vmatpush1.msra.mxu1 %v317_v63  ;;  %v454_v61 = vld [vmem:[%s4252_s1 + $0xda8] sm:$0xff]  ;;  %v197_v62 = vld [vmem:[%s4252_s1 + $0x5a0] sm:$0xff] }
  0xdf   :  { %1284 = vmatprep.subr.mxu0 %v54_v2  ;;  %1355 = vmatprep.subr.mxu1 %v310_v4  ;;  %v453_v63 = vld [vmem:[%s4252_s1 + $0xda0] sm:$0xff]  ;;  %v190_v2 = vld [vmem:[%s4252_s1 + $0x568] sm:$0xff] }
  0xe0   :  { %1285 = vmatpush1.msra.mxu0 %v53_v5  ;;  %1356 = vmatpush1.msra.mxu1 %v309_v6  ;;  %v446_v4 = vld [vmem:[%s4252_s1 + $0xd68] sm:$0xff]  ;;  %v189_v5 = vld [vmem:[%s4252_s1 + $0x560] sm:$0xff] }
  0xe1   :  { %1286 = vmatprep.subr.mxu0 %v46_v7  ;;  %1357 = vmatprep.subr.mxu1 %v302_v8  ;;  %v445_v6 = vld [vmem:[%s4252_s1 + $0xd60] sm:$0xff]  ;;  %v182_v7 = vld [vmem:[%s4252_s1 + $0x528] sm:$0xff] }
  0xe2   :  { %1287 = vmatpush1.msra.mxu0 %v45_v10  ;;  %1358 = vmatpush1.msra.mxu1 %v301_v11  ;;  %v438_v8 = vld [vmem:[%s4252_s1 + $0xd28] sm:$0xff]  ;;  %v181_v10 = vld [vmem:[%s4252_s1 + $0x520] sm:$0xff] }
  0xe3   :  { %1288 = vmatprep.subr.mxu0 %v38_v12  ;;  %1359 = vmatprep.subr.mxu1 %v294_v13  ;;  %v437_v11 = vld [vmem:[%s4252_s1 + $0xd20] sm:$0xff]  ;;  %v174_v12 = vld [vmem:[%s4252_s1 + $0x4e8] sm:$0xff] }
  0xe4   :  { %1289 = vmatpush1.msra.mxu0 %v37_v14  ;;  %1360 = vmatpush1.msra.mxu1 %v293_v15  ;;  %v430_v13 = vld [vmem:[%s4252_s1 + $0xce8] sm:$0xff]  ;;  %v173_v14 = vld [vmem:[%s4252_s1 + $0x4e0] sm:$0xff] }
  0xe5   :  { %1290 = vmatprep.subr.mxu0 %v30_v16  ;;  %1361 = vmatprep.subr.mxu1 %v286_v17  ;;  %v429_v15 = vld [vmem:[%s4252_s1 + $0xce0] sm:$0xff]  ;;  %v166_v16 = vld [vmem:[%s4252_s1 + $0x4a8] sm:$0xff] }
  0xe6   :  { %1291 = vmatpush1.msra.mxu0 %v29_v18  ;;  %1362 = vmatpush1.msra.mxu1 %v285_v19  ;;  %v422_v17 = vld [vmem:[%s4252_s1 + $0xca8] sm:$0xff]  ;;  %v165_v18 = vld [vmem:[%s4252_s1 + $0x4a0] sm:$0xff] }
  0xe7   :  { %1292 = vmatprep.subr.mxu0 %v22_v20  ;;  %1363 = vmatprep.subr.mxu1 %v278_v21  ;;  %v421_v19 = vld [vmem:[%s4252_s1 + $0xca0] sm:$0xff]  ;;  %v158_v20 = vld [vmem:[%s4252_s1 + $0x468] sm:$0xff] }
  0xe8   :  { %1293 = vmatpush1.msra.mxu0 %v21_v22  ;;  %1364 = vmatpush1.msra.mxu1 %v277_v23  ;;  %v414_v21 = vld [vmem:[%s4252_s1 + $0xc68] sm:$0xff]  ;;  %v157_v22 = vld [vmem:[%s4252_s1 + $0x460] sm:$0xff] }
  0xe9   :  { %1294 = vmatprep.subr.mxu0 %v270_v24  ;;  %1365 = vmatprep.subr.mxu1 %v526_v25  ;;  %v413_v23 = vld [vmem:[%s4252_s1 + $0xc60] sm:$0xff]  ;;  %v150_v24 = vld [vmem:[%s4252_s1 + $0x428] sm:$0xff] }
  0xea   :  { %1295 = vmatpush2.msra.mxu0 %v269_v26  ;;  %1366 = vmatpush2.msra.mxu1 %v525_v27  ;;  %v406_v25 = vld [vmem:[%s4252_s1 + $0xc28] sm:$0xff]  ;;  %v149_v26 = vld [vmem:[%s4252_s1 + $0x420] sm:$0xff] }
  0xeb   :  { %1296 = vmatprep.subr.mxu0 %v262_v28  ;;  %1367 = vmatprep.subr.mxu1 %v518_v29  ;;  %v405_v27 = vld [vmem:[%s4252_s1 + $0xc20] sm:$0xff]  ;;  %v654_v28 = vld [vmem:[%s4252_s1 + $0x13e8] sm:$0xff]  ;;  %v144_v29 = vld [vmem:[%s4252_s1 + $0x3f8] sm:$0xff] }
  0xec   :  { %1297 = vmatpush2.msra.mxu0 %v261_v1  ;;  %1368 = vmatpush2.msra.mxu1 %v517_v30  ;;  %v3428_v1 = vld [vmem:[%s4253_s0] sm:$0xff] }
  0xed   :  { %1298 = vmatprep.subr.mxu0 %v254_v31  ;;  %1369 = vmatprep.subr.mxu1 %v510_v32  ;;  %v653_v30 = vld [vmem:[%s4252_s1 + $0x13e0] sm:$0xff]  ;;  %v143_v31 = vld [vmem:[%s4252_s1 + $0x3f0] sm:$0xff]  ;;  %v646_v32 = vld [vmem:[%s4252_s1 + $0x13a8] sm:$0xff] }
  0xee   :  { %1299 = vmatpush2.msra.mxu0 %v253_v33  ;;  %1370 = vmatpush2.msra.mxu1 %v509_v34  ;;  %v136_v33 = vld [vmem:[%s4252_s1 + $0x3b8] sm:$0xff]  ;;  %v645_v34 = vld [vmem:[%s4252_s1 + $0x13a0] sm:$0xff] }
  0xef   :  { %1300 = vmatprep.subr.mxu0 %v246_v35  ;;  %1371 = vmatprep.subr.mxu1 %v502_v36  ;;  %v135_v35 = vld [vmem:[%s4252_s1 + $0x3b0] sm:$0xff]  ;;  %v638_v36 = vld [vmem:[%s4252_s1 + $0x1368] sm:$0xff] }
  0xf0   :  { %1301 = vmatpush2.msra.mxu0 %v245_v37  ;;  %1372 = vmatpush2.msra.mxu1 %v501_v38  ;;  %v128_v37 = vld [vmem:[%s4252_s1 + $0x378] sm:$0xff]  ;;  %v127_v38 = vld [vmem:[%s4252_s1 + $0x370] sm:$0xff] }
  0xf1   :  { %1302 = vmatprep.subr.mxu0 %v238_v39  ;;  %1373 = vmatprep.subr.mxu1 %v494_v40  ;;  %v630_v39 = vld [vmem:[%s4252_s1 + $0x1328] sm:$0xff]  ;;  %v120_v40 = vld [vmem:[%s4252_s1 + $0x338] sm:$0xff] }
  0xf2   :  { %1303 = vmatpush2.msra.mxu0 %v237_v41  ;;  %1374 = vmatpush2.msra.mxu1 %v493_v42  ;;  %v629_v41 = vld [vmem:[%s4252_s1 + $0x1320] sm:$0xff]  ;;  %v119_v42 = vld [vmem:[%s4252_s1 + $0x330] sm:$0xff] }
  0xf3   :  { %1304 = vmatprep.subr.mxu0 %v230_v43  ;;  %1375 = vmatprep.subr.mxu1 %v486_v44  ;;  %v622_v43 = vld [vmem:[%s4252_s1 + $0x12e8] sm:$0xff]  ;;  %v112_v44 = vld [vmem:[%s4252_s1 + $0x2f8] sm:$0xff] }
  0xf4   :  { %1305 = vmatpush2.msra.mxu0 %v229_v45  ;;  %1376 = vmatpush2.msra.mxu1 %v485_v46  ;;  %v621_v45 = vld [vmem:[%s4252_s1 + $0x12e0] sm:$0xff]  ;;  %v111_v46 = vld [vmem:[%s4252_s1 + $0x2f0] sm:$0xff] }
  0xf5   :  { %1306 = vmatprep.subr.mxu0 %v222_v47  ;;  %1377 = vmatprep.subr.mxu1 %v478_v48  ;;  %v614_v47 = vld [vmem:[%s4252_s1 + $0x12a8] sm:$0xff]  ;;  %v104_v48 = vld [vmem:[%s4252_s1 + $0x2b8] sm:$0xff] }
  0xf6   :  { %1307 = vmatpush2.msra.mxu0 %v221_v49  ;;  %1378 = vmatpush2.msra.mxu1 %v477_v50  ;;  %v613_v49 = vld [vmem:[%s4252_s1 + $0x12a0] sm:$0xff]  ;;  %v103_v50 = vld [vmem:[%s4252_s1 + $0x2b0] sm:$0xff] }
  0xf7   :  { %1308 = vmatprep.subr.mxu0 %v214_v51  ;;  %1379 = vmatprep.subr.mxu1 %v470_v52  ;;  %v606_v51 = vld [vmem:[%s4252_s1 + $0x1268] sm:$0xff]  ;;  %v96_v52 = vld [vmem:[%s4252_s1 + $0x278] sm:$0xff] }
  0xf8   :  { %1309 = vmatpush2.msra.mxu0 %v213_v53  ;;  %1380 = vmatpush2.msra.mxu1 %v469_v54  ;;  %v605_v53 = vld [vmem:[%s4252_s1 + $0x1260] sm:$0xff]  ;;  %v95_v54 = vld [vmem:[%s4252_s1 + $0x270] sm:$0xff] }
  0xf9   :  { %1310 = vmatprep.subr.mxu0 %v206_v55  ;;  %1381 = vmatprep.subr.mxu1 %v462_v57  ;;  %v598_v55 = vld [vmem:[%s4252_s1 + $0x1228] sm:$0xff]  ;;  %v88_v57 = vld [vmem:[%s4252_s1 + $0x238] sm:$0xff] }
  0xfa   :  { %1311 = vmatpush2.msra.mxu0 %v205_v58  ;;  %1382 = vmatpush2.msra.mxu1 %v461_v59  ;;  %v597_v58 = vld [vmem:[%s4252_s1 + $0x1220] sm:$0xff]  ;;  %v87_v59 = vld [vmem:[%s4252_s1 + $0x230] sm:$0xff] }
  0xfb   :  { %1312 = vmatprep.subr.mxu0 %v198_v60  ;;  %1383 = vmatprep.subr.mxu1 %v454_v61  ;;  %v590_v60 = vld [vmem:[%s4252_s1 + $0x11e8] sm:$0xff]  ;;  %v80_v61 = vld [vmem:[%s4252_s1 + $0x1f8] sm:$0xff] }
  0xfc   :  { %1313 = vmatpush2.msra.mxu0 %v197_v62  ;;  %1384 = vmatpush2.msra.mxu1 %v453_v63  ;;  %v589_v62 = vld [vmem:[%s4252_s1 + $0x11e0] sm:$0xff]  ;;  %v79_v63 = vld [vmem:[%s4252_s1 + $0x1f0] sm:$0xff] }
  0xfd   :  { %1314 = vmatprep.subr.mxu0 %v190_v2  ;;  %1385 = vmatprep.subr.mxu1 %v446_v4  ;;  %v582_v2 = vld [vmem:[%s4252_s1 + $0x11a8] sm:$0xff]  ;;  %v72_v4 = vld [vmem:[%s4252_s1 + $0x1b8] sm:$0xff] }
  0xfe   :  { %1315 = vmatpush2.msra.mxu0 %v189_v5  ;;  %1386 = vmatpush2.msra.mxu1 %v445_v6  ;;  %v581_v5 = vld [vmem:[%s4252_s1 + $0x11a0] sm:$0xff]  ;;  %v71_v6 = vld [vmem:[%s4252_s1 + $0x1b0] sm:$0xff] }
  0xff   :  { %1316 = vmatprep.subr.mxu0 %v182_v7  ;;  %1387 = vmatprep.subr.mxu1 %v438_v8  ;;  %v574_v7 = vld [vmem:[%s4252_s1 + $0x1168] sm:$0xff]  ;;  %v64_v8 = vld [vmem:[%s4252_s1 + $0x178] sm:$0xff] }
 0x100   :  { %1317 = vmatpush2.msra.mxu0 %v181_v10  ;;  %1388 = vmatpush2.msra.mxu1 %v437_v11  ;;  %v573_v10 = vld [vmem:[%s4252_s1 + $0x1160] sm:$0xff]  ;;  %v63_v11 = vld [vmem:[%s4252_s1 + $0x170] sm:$0xff] }
 0x101   :  { %1318 = vmatprep.subr.mxu0 %v174_v12  ;;  %1389 = vmatprep.subr.mxu1 %v430_v13  ;;  %v566_v12 = vld [vmem:[%s4252_s1 + $0x1128] sm:$0xff]  ;;  %v56_v13 = vld [vmem:[%s4252_s1 + $0x138] sm:$0xff] }
 0x102   :  { %1319 = vmatpush2.msra.mxu0 %v173_v14  ;;  %1390 = vmatpush2.msra.mxu1 %v429_v15  ;;  %v565_v14 = vld [vmem:[%s4252_s1 + $0x1120] sm:$0xff]  ;;  %v55_v15 = vld [vmem:[%s4252_s1 + $0x130] sm:$0xff] }
 0x103   :  { %1320 = vmatprep.subr.mxu0 %v166_v16  ;;  %1391 = vmatprep.subr.mxu1 %v422_v17  ;;  %v558_v16 = vld [vmem:[%s4252_s1 + $0x10e8] sm:$0xff]  ;;  %v48_v17 = vld [vmem:[%s4252_s1 + $0xf8] sm:$0xff] }
 0x104   :  { %1321 = vmatpush2.msra.mxu0 %v165_v18  ;;  %1392 = vmatpush2.msra.mxu1 %v421_v19  ;;  %v557_v18 = vld [vmem:[%s4252_s1 + $0x10e0] sm:$0xff]  ;;  %v47_v19 = vld [vmem:[%s4252_s1 + $0xf0] sm:$0xff] }
 0x105   :  { %1322 = vmatprep.subr.mxu0 %v158_v20  ;;  %1393 = vmatprep.subr.mxu1 %v414_v21  ;;  %v550_v20 = vld [vmem:[%s4252_s1 + $0x10a8] sm:$0xff]  ;;  %v40_v21 = vld [vmem:[%s4252_s1 + $0xb8] sm:$0xff] }
 0x106   :  { %1323 = vmatpush2.msra.mxu0 %v157_v22  ;;  %1394 = vmatpush2.msra.mxu1 %v413_v23  ;;  %v549_v22 = vld [vmem:[%s4252_s1 + $0x10a0] sm:$0xff]  ;;  %v39_v23 = vld [vmem:[%s4252_s1 + $0xb0] sm:$0xff] }
 0x107   :  { %1324 = vmatprep.subr.mxu0 %v150_v24  ;;  %1395 = vmatprep.subr.mxu1 %v406_v25  ;;  %v542_v24 = vld [vmem:[%s4252_s1 + $0x1068] sm:$0xff]  ;;  %v32_v25 = vld [vmem:[%s4252_s1 + $0x78] sm:$0xff] }
 0x108   :  { %1325 = vmatpush2.msra.mxu0 %v149_v26  ;;  %1326 = vmatprep.mubr.f32.mxu0 %v2231_v0  ;;  %v541_v26 = vld [vmem:[%s4252_s1 + $0x1060] sm:$0xff] }
 0x109   :  { %1396 = vmatpush2.msra.mxu1 %v405_v27  ;;  %1327 = vmatmul.mubr.f32.vlgmr.msra.gmra.mxu0 %v3428_v1  ;;  %v31_v27 = vld [vmem:[%s4252_s1 + $0x70] sm:$0xff] }
 0x10a   :  { %1397 = vmatprep.mubr.f32.mxu1 %v2239_v3  ;;  %1404 = vmatprep.subr.mxu0 %v654_v28  ;;  %v534_v28 = vld [vmem:[%s4252_s1 + $0x1028] sm:$0xff] }
 0x10b   :  { %1475 = vmatprep.subr.mxu1 %v144_v29  ;;  %1398 = vmatmul.mubr.f32.vlgmr.msra.gmra.mxu1 %v3035_v56  ;;  %v637_v56 = vld [vmem:[%s4252_s1 + $0x1360] sm:$0xff]  ;;  %v24_v29 = vld [vmem:[%s4252_s1 + $0x38] sm:$0xff] }
 0x10c   :  { %1405 = vmatpush1.msra.mxu0 %v653_v30  ;;  %1476 = vmatpush1.msra.mxu1 %v143_v31  ;;  %v533_v30 = vld [vmem:[%s4252_s1 + $0x1020] sm:$0xff]  ;;  %v23_v31 = vld [vmem:[%s4252_s1 + $0x30] sm:$0xff] }
 0x10d   :  { %1406 = vmatprep.subr.mxu0 %v646_v32  ;;  %1477 = vmatprep.subr.mxu1 %v136_v33  ;;  %v782_v32 = vld [vmem:[%s4252_s1 + $0x17e8] sm:$0xff]  ;;  %v272_v33 = vld [vmem:[%s4252_s1 + $0x7f8] sm:$0xff] }
 0x10e   :  { %1407 = vmatpush1.msra.mxu0 %v645_v34  ;;  %1478 = vmatpush1.msra.mxu1 %v135_v35  ;;  %v781_v34 = vld [vmem:[%s4252_s1 + $0x17e0] sm:$0xff]  ;;  %v271_v35 = vld [vmem:[%s4252_s1 + $0x7f0] sm:$0xff] }
 0x10f   :  { %1408 = vmatprep.subr.mxu0 %v638_v36  ;;  %1479 = vmatprep.subr.mxu1 %v128_v37  ;;  %v774_v36 = vld [vmem:[%s4252_s1 + $0x17a8] sm:$0xff]  ;;  %v264_v37 = vld [vmem:[%s4252_s1 + $0x7b8] sm:$0xff] }
 0x110   :  { %1409 = vmatpush1.msra.mxu0 %v637_v56  ;;  %1480 = vmatpush1.msra.mxu1 %v127_v38  ;;  %v773_v56 = vld [vmem:[%s4252_s1 + $0x17a0] sm:$0xff]  ;;  %v263_v38 = vld [vmem:[%s4252_s1 + $0x7b0] sm:$0xff] }
 0x111   :  { %1410 = vmatprep.subr.mxu0 %v630_v39  ;;  %1481 = vmatprep.subr.mxu1 %v120_v40  ;;  %v766_v39 = vld [vmem:[%s4252_s1 + $0x1768] sm:$0xff]  ;;  %v256_v40 = vld [vmem:[%s4252_s1 + $0x778] sm:$0xff] }
 0x112   :  { %1411 = vmatpush1.msra.mxu0 %v629_v41  ;;  %1482 = vmatpush1.msra.mxu1 %v119_v42  ;;  %v765_v41 = vld [vmem:[%s4252_s1 + $0x1760] sm:$0xff]  ;;  %v255_v42 = vld [vmem:[%s4252_s1 + $0x770] sm:$0xff] }
 0x113   :  { %1412 = vmatprep.subr.mxu0 %v622_v43  ;;  %1483 = vmatprep.subr.mxu1 %v112_v44  ;;  %v758_v43 = vld [vmem:[%s4252_s1 + $0x1728] sm:$0xff]  ;;  %v248_v44 = vld [vmem:[%s4252_s1 + $0x738] sm:$0xff] }
 0x114   :  { %1413 = vmatpush1.msra.mxu0 %v621_v45  ;;  %1484 = vmatpush1.msra.mxu1 %v111_v46  ;;  %v757_v45 = vld [vmem:[%s4252_s1 + $0x1720] sm:$0xff]  ;;  %v247_v46 = vld [vmem:[%s4252_s1 + $0x730] sm:$0xff] }
 0x115   :  { %1414 = vmatprep.subr.mxu0 %v614_v47  ;;  %1485 = vmatprep.subr.mxu1 %v104_v48  ;;  %v750_v47 = vld [vmem:[%s4252_s1 + $0x16e8] sm:$0xff]  ;;  %v240_v48 = vld [vmem:[%s4252_s1 + $0x6f8] sm:$0xff] }
 0x116   :  { %1415 = vmatpush1.msra.mxu0 %v613_v49  ;;  %1486 = vmatpush1.msra.mxu1 %v103_v50  ;;  %v749_v49 = vld [vmem:[%s4252_s1 + $0x16e0] sm:$0xff]  ;;  %v239_v50 = vld [vmem:[%s4252_s1 + $0x6f0] sm:$0xff] }
 0x117   :  { %1416 = vmatprep.subr.mxu0 %v606_v51  ;;  %1487 = vmatprep.subr.mxu1 %v96_v52  ;;  %v742_v51 = vld [vmem:[%s4252_s1 + $0x16a8] sm:$0xff]  ;;  %v232_v52 = vld [vmem:[%s4252_s1 + $0x6b8] sm:$0xff] }
 0x118   :  { %1417 = vmatpush1.msra.mxu0 %v605_v53  ;;  %1488 = vmatpush1.msra.mxu1 %v95_v54  ;;  %v741_v53 = vld [vmem:[%s4252_s1 + $0x16a0] sm:$0xff]  ;;  %v231_v54 = vld [vmem:[%s4252_s1 + $0x6b0] sm:$0xff] }
 0x119   :  { %1418 = vmatprep.subr.mxu0 %v598_v55  ;;  %1489 = vmatprep.subr.mxu1 %v88_v57  ;;  %v734_v55 = vld [vmem:[%s4252_s1 + $0x1668] sm:$0xff]  ;;  %v224_v57 = vld [vmem:[%s4252_s1 + $0x678] sm:$0xff] }
 0x11a   :  { %1419 = vmatpush1.msra.mxu0 %v597_v58  ;;  %1490 = vmatpush1.msra.mxu1 %v87_v59  ;;  %v733_v58 = vld [vmem:[%s4252_s1 + $0x1660] sm:$0xff]  ;;  %v223_v59 = vld [vmem:[%s4252_s1 + $0x670] sm:$0xff] }
 0x11b   :  { %1420 = vmatprep.subr.mxu0 %v590_v60  ;;  %1491 = vmatprep.subr.mxu1 %v80_v61  ;;  %v726_v60 = vld [vmem:[%s4252_s1 + $0x1628] sm:$0xff]  ;;  %v216_v61 = vld [vmem:[%s4252_s1 + $0x638] sm:$0xff] }
 0x11c   :  { %1421 = vmatpush1.msra.mxu0 %v589_v62  ;;  %1492 = vmatpush1.msra.mxu1 %v79_v63  ;;  %v725_v62 = vld [vmem:[%s4252_s1 + $0x1620] sm:$0xff]  ;;  %v215_v63 = vld [vmem:[%s4252_s1 + $0x630] sm:$0xff] }
 0x11d   :  { %1422 = vmatprep.subr.mxu0 %v582_v2  ;;  %1493 = vmatprep.subr.mxu1 %v72_v4  ;;  %v718_v2 = vld [vmem:[%s4252_s1 + $0x15e8] sm:$0xff]  ;;  %v208_v4 = vld [vmem:[%s4252_s1 + $0x5f8] sm:$0xff] }
 0x11e   :  { %1423 = vmatpush1.msra.mxu0 %v581_v5  ;;  %1494 = vmatpush1.msra.mxu1 %v71_v6  ;;  %v717_v5 = vld [vmem:[%s4252_s1 + $0x15e0] sm:$0xff]  ;;  %v207_v6 = vld [vmem:[%s4252_s1 + $0x5f0] sm:$0xff] }
 0x11f   :  { %1424 = vmatprep.subr.mxu0 %v574_v7  ;;  %1495 = vmatprep.subr.mxu1 %v64_v8  ;;  %v710_v7 = vld [vmem:[%s4252_s1 + $0x15a8] sm:$0xff]  ;;  %v200_v8 = vld [vmem:[%s4252_s1 + $0x5b8] sm:$0xff] }
 0x120   :  { %1425 = vmatpush1.msra.mxu0 %v573_v10  ;;  %1496 = vmatpush1.msra.mxu1 %v63_v11  ;;  %v709_v10 = vld [vmem:[%s4252_s1 + $0x15a0] sm:$0xff]  ;;  %v199_v11 = vld [vmem:[%s4252_s1 + $0x5b0] sm:$0xff] }
 0x121   :  { %1426 = vmatprep.subr.mxu0 %v566_v12  ;;  %1497 = vmatprep.subr.mxu1 %v56_v13  ;;  %v702_v12 = vld [vmem:[%s4252_s1 + $0x1568] sm:$0xff]  ;;  %v192_v13 = vld [vmem:[%s4252_s1 + $0x578] sm:$0xff] }
 0x122   :  { %1427 = vmatpush1.msra.mxu0 %v565_v14  ;;  %1498 = vmatpush1.msra.mxu1 %v55_v15  ;;  %v701_v14 = vld [vmem:[%s4252_s1 + $0x1560] sm:$0xff]  ;;  %v191_v15 = vld [vmem:[%s4252_s1 + $0x570] sm:$0xff] }
 0x123   :  { %1428 = vmatprep.subr.mxu0 %v558_v16  ;;  %1499 = vmatprep.subr.mxu1 %v48_v17  ;;  %v694_v16 = vld [vmem:[%s4252_s1 + $0x1528] sm:$0xff]  ;;  %v184_v17 = vld [vmem:[%s4252_s1 + $0x538] sm:$0xff] }
 0x124   :  { %1429 = vmatpush1.msra.mxu0 %v557_v18  ;;  %1500 = vmatpush1.msra.mxu1 %v47_v19  ;;  %v693_v18 = vld [vmem:[%s4252_s1 + $0x1520] sm:$0xff]  ;;  %v183_v19 = vld [vmem:[%s4252_s1 + $0x530] sm:$0xff] }
 0x125   :  { %1430 = vmatprep.subr.mxu0 %v550_v20  ;;  %1501 = vmatprep.subr.mxu1 %v40_v21  ;;  %v686_v20 = vld [vmem:[%s4252_s1 + $0x14e8] sm:$0xff]  ;;  %v176_v21 = vld [vmem:[%s4252_s1 + $0x4f8] sm:$0xff] }
 0x126   :  { %1431 = vmatpush1.msra.mxu0 %v549_v22  ;;  %1502 = vmatpush1.msra.mxu1 %v39_v23  ;;  %v685_v22 = vld [vmem:[%s4252_s1 + $0x14e0] sm:$0xff]  ;;  %v175_v23 = vld [vmem:[%s4252_s1 + $0x4f0] sm:$0xff] }
 0x127   :  { %1432 = vmatprep.subr.mxu0 %v542_v24  ;;  %1503 = vmatprep.subr.mxu1 %v32_v25  ;;  %v678_v24 = vld [vmem:[%s4252_s1 + $0x14a8] sm:$0xff]  ;;  %v168_v25 = vld [vmem:[%s4252_s1 + $0x4b8] sm:$0xff] }
 0x128   :  { %1433 = vmatpush1.msra.mxu0 %v541_v26  ;;  %1504 = vmatpush1.msra.mxu1 %v31_v27  ;;  %v677_v26 = vld [vmem:[%s4252_s1 + $0x14a0] sm:$0xff]  ;;  %v167_v27 = vld [vmem:[%s4252_s1 + $0x4b0] sm:$0xff] }
 0x129   :  { %1434 = vmatprep.subr.mxu0 %v534_v28  ;;  %1505 = vmatprep.subr.mxu1 %v24_v29  ;;  %v670_v28 = vld [vmem:[%s4252_s1 + $0x1468] sm:$0xff]  ;;  %v160_v29 = vld [vmem:[%s4252_s1 + $0x478] sm:$0xff] }
 0x12a   :  { %1435 = vmatpush1.msra.mxu0 %v533_v30  ;;  %1506 = vmatpush1.msra.mxu1 %v23_v31  ;;  %v669_v30 = vld [vmem:[%s4252_s1 + $0x1460] sm:$0xff]  ;;  %v159_v31 = vld [vmem:[%s4252_s1 + $0x470] sm:$0xff] }
 0x12b   :  { %1436 = vmatprep.subr.mxu0 %v782_v32  ;;  %1507 = vmatprep.subr.mxu1 %v272_v33  ;;  %v662_v32 = vld [vmem:[%s4252_s1 + $0x1428] sm:$0xff]  ;;  %v152_v33 = vld [vmem:[%s4252_s1 + $0x438] sm:$0xff] }
 0x12c   :  { %1437 = vmatpush2.msra.mxu0 %v781_v34  ;;  %1508 = vmatpush2.msra.mxu1 %v271_v35  ;;  %v661_v34 = vld [vmem:[%s4252_s1 + $0x1420] sm:$0xff]  ;;  %v151_v35 = vld [vmem:[%s4252_s1 + $0x430] sm:$0xff] }
 0x12d   :  { %1438 = vmatprep.subr.mxu0 %v774_v36  ;;  %1509 = vmatprep.subr.mxu1 %v264_v37  ;;  %v400_v36 = vld [vmem:[%s4252_s1 + $0xbf8] sm:$0xff] }
 0x12e   :  { %1439 = vmatpush2.msra.mxu0 %v773_v56  ;;  %1510 = vmatpush2.msra.mxu1 %v263_v38  ;;  %v656_v37 = vld [vmem:[%s4252_s1 + $0x13f8] sm:$0xff]  ;;  %v3821_v56 = vld [vmem:[%s4253_s0 + $0x10] sm:$0xff] }
 0x12f   :  { %1440 = vmatprep.subr.mxu0 %v766_v39  ;;  %1511 = vmatprep.subr.mxu1 %v256_v40  ;;  %v399_v38 = vld [vmem:[%s4252_s1 + $0xbf0] sm:$0xff]  ;;  %v392_v40 = vld [vmem:[%s4252_s1 + $0xbb8] sm:$0xff] }
 0x130   :  { %1441 = vmatpush2.msra.mxu0 %v765_v41  ;;  %1512 = vmatpush2.msra.mxu1 %v255_v42  ;;  %v655_v39 = vld [vmem:[%s4252_s1 + $0x13f0] sm:$0xff]  ;;  %v648_v41 = vld [vmem:[%s4252_s1 + $0x13b8] sm:$0xff] }
 0x131   :  { %1442 = vmatprep.subr.mxu0 %v758_v43  ;;  %1513 = vmatprep.subr.mxu1 %v248_v44  ;;  %v391_v42 = vld [vmem:[%s4252_s1 + $0xbb0] sm:$0xff]  ;;  %v384_v43 = vld [vmem:[%s4252_s1 + $0xb78] sm:$0xff] }
 0x132   :  { %1443 = vmatpush2.msra.mxu0 %v757_v45  ;;  %1514 = vmatpush2.msra.mxu1 %v247_v46  ;;  %v640_v44 = vld [vmem:[%s4252_s1 + $0x1378] sm:$0xff]  ;;  %v639_v45 = vld [vmem:[%s4252_s1 + $0x1370] sm:$0xff] }
 0x133   :  { %1444 = vmatprep.subr.mxu0 %v750_v47  ;;  %1515 = vmatprep.subr.mxu1 %v240_v48  ;;  %v376_v46 = vld [vmem:[%s4252_s1 + $0xb38] sm:$0xff]  ;;  %v375_v48 = vld [vmem:[%s4252_s1 + $0xb30] sm:$0xff] }
 0x134   :  { %1445 = vmatpush2.msra.mxu0 %v749_v49  ;;  %1516 = vmatpush2.msra.mxu1 %v239_v50  ;;  %v632_v47 = vld [vmem:[%s4252_s1 + $0x1338] sm:$0xff]  ;;  %v631_v49 = vld [vmem:[%s4252_s1 + $0x1330] sm:$0xff] }
 0x135   :  { %1446 = vmatprep.subr.mxu0 %v742_v51  ;;  %1517 = vmatprep.subr.mxu1 %v232_v52  ;;  %v368_v50 = vld [vmem:[%s4252_s1 + $0xaf8] sm:$0xff]  ;;  %v367_v52 = vld [vmem:[%s4252_s1 + $0xaf0] sm:$0xff] }
 0x136   :  { %1447 = vmatpush2.msra.mxu0 %v741_v53  ;;  %1518 = vmatpush2.msra.mxu1 %v231_v54  ;;  %v624_v51 = vld [vmem:[%s4252_s1 + $0x12f8] sm:$0xff]  ;;  %v623_v53 = vld [vmem:[%s4252_s1 + $0x12f0] sm:$0xff] }
 0x137   :  { %1448 = vmatprep.subr.mxu0 %v734_v55  ;;  %1519 = vmatprep.subr.mxu1 %v224_v57  ;;  %v360_v54 = vld [vmem:[%s4252_s1 + $0xab8] sm:$0xff]  ;;  %v359_v57 = vld [vmem:[%s4252_s1 + $0xab0] sm:$0xff] }
 0x138   :  { %1449 = vmatpush2.msra.mxu0 %v733_v58  ;;  %1520 = vmatpush2.msra.mxu1 %v223_v59  ;;  %v616_v55 = vld [vmem:[%s4252_s1 + $0x12b8] sm:$0xff]  ;;  %v615_v58 = vld [vmem:[%s4252_s1 + $0x12b0] sm:$0xff] }
 0x139   :  { %1450 = vmatprep.subr.mxu0 %v726_v60  ;;  %1521 = vmatprep.subr.mxu1 %v216_v61  ;;  %v352_v59 = vld [vmem:[%s4252_s1 + $0xa78] sm:$0xff]  ;;  %v351_v61 = vld [vmem:[%s4252_s1 + $0xa70] sm:$0xff] }
 0x13a   :  { %1451 = vmatpush2.msra.mxu0 %v725_v62  ;;  %1522 = vmatpush2.msra.mxu1 %v215_v63  ;;  %v608_v60 = vld [vmem:[%s4252_s1 + $0x1278] sm:$0xff]  ;;  %v607_v62 = vld [vmem:[%s4252_s1 + $0x1270] sm:$0xff] }
 0x13b   :  { %1452 = vmatprep.subr.mxu0 %v718_v2  ;;  %1523 = vmatprep.subr.mxu1 %v208_v4  ;;  %v344_v63 = vld [vmem:[%s4252_s1 + $0xa38] sm:$0xff]  ;;  %v343_v4 = vld [vmem:[%s4252_s1 + $0xa30] sm:$0xff] }
 0x13c   :  { %1453 = vmatpush2.msra.mxu0 %v717_v5  ;;  %1524 = vmatpush2.msra.mxu1 %v207_v6  ;;  %v600_v2 = vld [vmem:[%s4252_s1 + $0x1238] sm:$0xff]  ;;  %v599_v5 = vld [vmem:[%s4252_s1 + $0x1230] sm:$0xff] }
 0x13d   :  { %1454 = vmatprep.subr.mxu0 %v710_v7  ;;  %1525 = vmatprep.subr.mxu1 %v200_v8  ;;  %v336_v6 = vld [vmem:[%s4252_s1 + $0x9f8] sm:$0xff]  ;;  %v335_v8 = vld [vmem:[%s4252_s1 + $0x9f0] sm:$0xff] }
 0x13e   :  { %1455 = vmatpush2.msra.mxu0 %v709_v10  ;;  %1526 = vmatpush2.msra.mxu1 %v199_v11  ;;  %v592_v7 = vld [vmem:[%s4252_s1 + $0x11f8] sm:$0xff]  ;;  %v591_v10 = vld [vmem:[%s4252_s1 + $0x11f0] sm:$0xff] }
 0x13f   :  { %1456 = vmatprep.subr.mxu0 %v702_v12  ;;  %1527 = vmatprep.subr.mxu1 %v192_v13  ;;  %v328_v11 = vld [vmem:[%s4252_s1 + $0x9b8] sm:$0xff]  ;;  %v327_v13 = vld [vmem:[%s4252_s1 + $0x9b0] sm:$0xff] }
 0x140   :  { %1457 = vmatpush2.msra.mxu0 %v701_v14  ;;  %1528 = vmatpush2.msra.mxu1 %v191_v15  ;;  %v584_v12 = vld [vmem:[%s4252_s1 + $0x11b8] sm:$0xff]  ;;  %v583_v14 = vld [vmem:[%s4252_s1 + $0x11b0] sm:$0xff] }
 0x141   :  { %1458 = vmatprep.subr.mxu0 %v694_v16  ;;  %1529 = vmatprep.subr.mxu1 %v184_v17  ;;  %v320_v15 = vld [vmem:[%s4252_s1 + $0x978] sm:$0xff]  ;;  %v319_v17 = vld [vmem:[%s4252_s1 + $0x970] sm:$0xff] }
 0x142   :  { %1459 = vmatpush2.msra.mxu0 %v693_v18  ;;  %1530 = vmatpush2.msra.mxu1 %v183_v19  ;;  %v576_v16 = vld [vmem:[%s4252_s1 + $0x1178] sm:$0xff]  ;;  %v575_v18 = vld [vmem:[%s4252_s1 + $0x1170] sm:$0xff] }
 0x143   :  { %1460 = vmatprep.subr.mxu0 %v686_v20  ;;  %1531 = vmatprep.subr.mxu1 %v176_v21  ;;  %v312_v19 = vld [vmem:[%s4252_s1 + $0x938] sm:$0xff]  ;;  %v311_v21 = vld [vmem:[%s4252_s1 + $0x930] sm:$0xff] }
 0x144   :  { %1461 = vmatpush2.msra.mxu0 %v685_v22  ;;  %1532 = vmatpush2.msra.mxu1 %v175_v23  ;;  %v568_v20 = vld [vmem:[%s4252_s1 + $0x1138] sm:$0xff]  ;;  %v567_v22 = vld [vmem:[%s4252_s1 + $0x1130] sm:$0xff] }
 0x145   :  { %1462 = vmatprep.subr.mxu0 %v678_v24  ;;  %1533 = vmatprep.subr.mxu1 %v168_v25  ;;  %v304_v23 = vld [vmem:[%s4252_s1 + $0x8f8] sm:$0xff]  ;;  %v303_v25 = vld [vmem:[%s4252_s1 + $0x8f0] sm:$0xff] }
 0x146   :  { %1463 = vmatpush2.msra.mxu0 %v677_v26  ;;  %1534 = vmatpush2.msra.mxu1 %v167_v27  ;;  %v560_v24 = vld [vmem:[%s4252_s1 + $0x10f8] sm:$0xff]  ;;  %v559_v26 = vld [vmem:[%s4252_s1 + $0x10f0] sm:$0xff] }
 0x147   :  { %1464 = vmatprep.subr.mxu0 %v670_v28  ;;  %1535 = vmatprep.subr.mxu1 %v160_v29  ;;  %v296_v27 = vld [vmem:[%s4252_s1 + $0x8b8] sm:$0xff]  ;;  %v295_v29 = vld [vmem:[%s4252_s1 + $0x8b0] sm:$0xff] }
 0x148   :  { %1465 = vmatpush2.msra.mxu0 %v669_v30  ;;  %1536 = vmatpush2.msra.mxu1 %v159_v31  ;;  %v552_v28 = vld [vmem:[%s4252_s1 + $0x10b8] sm:$0xff]  ;;  %v551_v30 = vld [vmem:[%s4252_s1 + $0x10b0] sm:$0xff] }
 0x149   :  { %1466 = vmatprep.subr.mxu0 %v662_v32  ;;  %1537 = vmatprep.subr.mxu1 %v152_v33  ;;  %v288_v31 = vld [vmem:[%s4252_s1 + $0x878] sm:$0xff]  ;;  %v287_v33 = vld [vmem:[%s4252_s1 + $0x870] sm:$0xff] }
 0x14a   :  { %1467 = vmatpush2.msra.mxu0 %v661_v34  ;;  %1468 = vmatprep.mubr.f32.mxu0 %v2629_v9  ;;  %v544_v32 = vld [vmem:[%s4252_s1 + $0x1078] sm:$0xff]  ;;  %v543_v34 = vld [vmem:[%s4252_s1 + $0x1070] sm:$0xff] }
 0x14b   :  { %1538 = vmatpush2.msra.mxu1 %v151_v35  ;;  %1469 = vmatmul.mubr.f32.vlgmr.msra.gmra.mxu0 %v3821_v56  ;;  %v280_v35 = vld [vmem:[%s4252_s1 + $0x838] sm:$0xff] }
 0x14c   :  { %1539 = vmatprep.mubr.f32.mxu1 %v2231_v0  ;;  %1546 = vmatprep.subr.mxu0 %v400_v36  ;;  %v647_v0 = vld [vmem:[%s4252_s1 + $0x13b0] sm:$0xff]  ;;  %v536_v36 = vld [vmem:[%s4252_s1 + $0x1038] sm:$0xff] }
 0x14d   :  { %1617 = vmatprep.subr.mxu1 %v656_v37  ;;  %1540 = vmatmul.mubr.f32.vlgmr.msra.gmra.mxu1 %v3428_v1  ;;  %v383_v1 = vld [vmem:[%s4252_s1 + $0xb70] sm:$0xff] }
 0x14e   :  { %1547 = vmatpush1.msra.mxu0 %v399_v38  ;;  %1618 = vmatpush1.msra.mxu1 %v655_v39  ;;  %v279_v37 = vld [vmem:[%s4252_s1 + $0x830] sm:$0xff]  ;;  %v528_v39 = vld [vmem:[%s4252_s1 + $0xff8] sm:$0xff] }
 0x14f   :  { %1548 = vmatprep.subr.mxu0 %v392_v40  ;;  %1619 = vmatprep.subr.mxu1 %v648_v41  ;;  %v535_v38 = vld [vmem:[%s4252_s1 + $0x1030] sm:$0xff]  ;;  %v784_v40 = vld [vmem:[%s4252_s1 + $0x17f8] sm:$0xff] }
 0x150   :  { %1549 = vmatpush1.msra.mxu0 %v391_v42  ;;  %1620 = vmatpush1.msra.mxu1 %v647_v0  ;;  %v527_v41 = vld [vmem:[%s4252_s1 + $0xff0] sm:$0xff]  ;;  %v520_v0 = vld [vmem:[%s4252_s1 + $0xfb8] sm:$0xff] }
 0x151   :  { %1550 = vmatprep.subr.mxu0 %v384_v43  ;;  %1621 = vmatprep.subr.mxu1 %v640_v44  ;;  %v783_v42 = vld [vmem:[%s4252_s1 + $0x17f0] sm:$0xff]  ;;  %v776_v43 = vld [vmem:[%s4252_s1 + $0x17b8] sm:$0xff] }
 0x152   :  { %1551 = vmatpush1.msra.mxu0 %v383_v1  ;;  %1622 = vmatpush1.msra.mxu1 %v639_v45  ;;  %v519_v44 = vld [vmem:[%s4252_s1 + $0xfb0] sm:$0xff]  ;;  %v512_v45 = vld [vmem:[%s4252_s1 + $0xf78] sm:$0xff] }
 0x153   :  { %1552 = vmatprep.subr.mxu0 %v376_v46  ;;  %1623 = vmatprep.subr.mxu1 %v632_v47  ;;  %v775_v1 = vld [vmem:[%s4252_s1 + $0x17b0] sm:$0xff]  ;;  %v768_v46 = vld [vmem:[%s4252_s1 + $0x1778] sm:$0xff] }
 0x154   :  { %1553 = vmatpush1.msra.mxu0 %v375_v48  ;;  %1624 = vmatpush1.msra.mxu1 %v631_v49  ;;  %v511_v47 = vld [vmem:[%s4252_s1 + $0xf70] sm:$0xff]  ;;  %v504_v49 = vld [vmem:[%s4252_s1 + $0xf38] sm:$0xff] }
 0x155   :  { %1554 = vmatprep.subr.mxu0 %v368_v50  ;;  %1625 = vmatprep.subr.mxu1 %v624_v51  ;;  %v767_v48 = vld [vmem:[%s4252_s1 + $0x1770] sm:$0xff]  ;;  %v760_v50 = vld [vmem:[%s4252_s1 + $0x1738] sm:$0xff] }
 0x156   :  { %1555 = vmatpush1.msra.mxu0 %v367_v52  ;;  %1626 = vmatpush1.msra.mxu1 %v623_v53  ;;  %v503_v51 = vld [vmem:[%s4252_s1 + $0xf30] sm:$0xff]  ;;  %v496_v53 = vld [vmem:[%s4252_s1 + $0xef8] sm:$0xff] }
 0x157   :  { %1556 = vmatprep.subr.mxu0 %v360_v54  ;;  %1627 = vmatprep.subr.mxu1 %v616_v55  ;;  %v759_v52 = vld [vmem:[%s4252_s1 + $0x1730] sm:$0xff]  ;;  %v752_v54 = vld [vmem:[%s4252_s1 + $0x16f8] sm:$0xff] }
 0x158   :  { %1557 = vmatpush1.msra.mxu0 %v359_v57  ;;  %1628 = vmatpush1.msra.mxu1 %v615_v58  ;;  %v495_v55 = vld [vmem:[%s4252_s1 + $0xef0] sm:$0xff]  ;;  %v488_v58 = vld [vmem:[%s4252_s1 + $0xeb8] sm:$0xff] }
 0x159   :  { %1558 = vmatprep.subr.mxu0 %v352_v59  ;;  %1629 = vmatprep.subr.mxu1 %v608_v60  ;;  %v751_v57 = vld [vmem:[%s4252_s1 + $0x16f0] sm:$0xff]  ;;  %v744_v59 = vld [vmem:[%s4252_s1 + $0x16b8] sm:$0xff] }
 0x15a   :  { %1559 = vmatpush1.msra.mxu0 %v351_v61  ;;  %1630 = vmatpush1.msra.mxu1 %v607_v62  ;;  %v487_v60 = vld [vmem:[%s4252_s1 + $0xeb0] sm:$0xff]  ;;  %v480_v62 = vld [vmem:[%s4252_s1 + $0xe78] sm:$0xff] }
 0x15b   :  { %1560 = vmatprep.subr.mxu0 %v344_v63  ;;  %1631 = vmatprep.subr.mxu1 %v600_v2  ;;  %v743_v61 = vld [vmem:[%s4252_s1 + $0x16b0] sm:$0xff]  ;;  %v736_v63 = vld [vmem:[%s4252_s1 + $0x1678] sm:$0xff] }
 0x15c   :  { %1561 = vmatpush1.msra.mxu0 %v343_v4  ;;  %1632 = vmatpush1.msra.mxu1 %v599_v5  ;;  %v479_v2 = vld [vmem:[%s4252_s1 + $0xe70] sm:$0xff]  ;;  %v472_v5 = vld [vmem:[%s4252_s1 + $0xe38] sm:$0xff] }
 0x15d   :  { %1562 = vmatprep.subr.mxu0 %v336_v6  ;;  %1633 = vmatprep.subr.mxu1 %v592_v7  ;;  %v735_v4 = vld [vmem:[%s4252_s1 + $0x1670] sm:$0xff]  ;;  %v728_v6 = vld [vmem:[%s4252_s1 + $0x1638] sm:$0xff] }
 0x15e   :  { %1563 = vmatpush1.msra.mxu0 %v335_v8  ;;  %1634 = vmatpush1.msra.mxu1 %v591_v10  ;;  %v471_v7 = vld [vmem:[%s4252_s1 + $0xe30] sm:$0xff]  ;;  %v464_v10 = vld [vmem:[%s4252_s1 + $0xdf8] sm:$0xff] }
 0x15f   :  { %1564 = vmatprep.subr.mxu0 %v328_v11  ;;  %1635 = vmatprep.subr.mxu1 %v584_v12  ;;  %v727_v8 = vld [vmem:[%s4252_s1 + $0x1630] sm:$0xff]  ;;  %v720_v11 = vld [vmem:[%s4252_s1 + $0x15f8] sm:$0xff] }
 0x160   :  { %1565 = vmatpush1.msra.mxu0 %v327_v13  ;;  %1636 = vmatpush1.msra.mxu1 %v583_v14  ;;  %v463_v12 = vld [vmem:[%s4252_s1 + $0xdf0] sm:$0xff]  ;;  %v456_v14 = vld [vmem:[%s4252_s1 + $0xdb8] sm:$0xff] }
 0x161   :  { %1566 = vmatprep.subr.mxu0 %v320_v15  ;;  %1637 = vmatprep.subr.mxu1 %v576_v16  ;;  %v719_v13 = vld [vmem:[%s4252_s1 + $0x15f0] sm:$0xff]  ;;  %v712_v15 = vld [vmem:[%s4252_s1 + $0x15b8] sm:$0xff] }
 0x162   :  { %1567 = vmatpush1.msra.mxu0 %v319_v17  ;;  %1638 = vmatpush1.msra.mxu1 %v575_v18  ;;  %v455_v16 = vld [vmem:[%s4252_s1 + $0xdb0] sm:$0xff]  ;;  %v448_v18 = vld [vmem:[%s4252_s1 + $0xd78] sm:$0xff] }
 0x163   :  { %1568 = vmatprep.subr.mxu0 %v312_v19  ;;  %1639 = vmatprep.subr.mxu1 %v568_v20  ;;  %v711_v17 = vld [vmem:[%s4252_s1 + $0x15b0] sm:$0xff]  ;;  %v704_v19 = vld [vmem:[%s4252_s1 + $0x1578] sm:$0xff] }
 0x164   :  { %1569 = vmatpush1.msra.mxu0 %v311_v21  ;;  %1640 = vmatpush1.msra.mxu1 %v567_v22  ;;  %v447_v20 = vld [vmem:[%s4252_s1 + $0xd70] sm:$0xff]  ;;  %v440_v22 = vld [vmem:[%s4252_s1 + $0xd38] sm:$0xff] }
 0x165   :  { %1570 = vmatprep.subr.mxu0 %v304_v23  ;;  %1641 = vmatprep.subr.mxu1 %v560_v24  ;;  %v703_v21 = vld [vmem:[%s4252_s1 + $0x1570] sm:$0xff]  ;;  %v696_v23 = vld [vmem:[%s4252_s1 + $0x1538] sm:$0xff] }
 0x166   :  { %1571 = vmatpush1.msra.mxu0 %v303_v25  ;;  %1642 = vmatpush1.msra.mxu1 %v559_v26  ;;  %v439_v24 = vld [vmem:[%s4252_s1 + $0xd30] sm:$0xff]  ;;  %v432_v26 = vld [vmem:[%s4252_s1 + $0xcf8] sm:$0xff] }
 0x167   :  { %1572 = vmatprep.subr.mxu0 %v296_v27  ;;  %1643 = vmatprep.subr.mxu1 %v552_v28  ;;  %v695_v25 = vld [vmem:[%s4252_s1 + $0x1530] sm:$0xff]  ;;  %v688_v27 = vld [vmem:[%s4252_s1 + $0x14f8] sm:$0xff] }
 0x168   :  { %1573 = vmatpush1.msra.mxu0 %v295_v29  ;;  %1644 = vmatpush1.msra.mxu1 %v551_v30  ;;  %v431_v28 = vld [vmem:[%s4252_s1 + $0xcf0] sm:$0xff]  ;;  %v424_v30 = vld [vmem:[%s4252_s1 + $0xcb8] sm:$0xff] }
 0x169   :  { %1574 = vmatprep.subr.mxu0 %v288_v31  ;;  %1645 = vmatprep.subr.mxu1 %v544_v32  ;;  %v687_v29 = vld [vmem:[%s4252_s1 + $0x14f0] sm:$0xff]  ;;  %v680_v31 = vld [vmem:[%s4252_s1 + $0x14b8] sm:$0xff] }
 0x16a   :  { %1575 = vmatpush1.msra.mxu0 %v287_v33  ;;  %1646 = vmatpush1.msra.mxu1 %v543_v34  ;;  %v423_v32 = vld [vmem:[%s4252_s1 + $0xcb0] sm:$0xff]  ;;  %v416_v34 = vld [vmem:[%s4252_s1 + $0xc78] sm:$0xff] }
 0x16b   :  { %1576 = vmatprep.subr.mxu0 %v280_v35  ;;  %1647 = vmatprep.subr.mxu1 %v536_v36  ;;  %v679_v33 = vld [vmem:[%s4252_s1 + $0x14b0] sm:$0xff]  ;;  %v672_v35 = vld [vmem:[%s4252_s1 + $0x1478] sm:$0xff] }
 0x16c   :  { %1577 = vmatpush1.msra.mxu0 %v279_v37  ;;  %1648 = vmatpush1.msra.mxu1 %v535_v38  ;;  %v415_v36 = vld [vmem:[%s4252_s1 + $0xc70] sm:$0xff]  ;;  %v408_v38 = vld [vmem:[%s4252_s1 + $0xc38] sm:$0xff] }
 0x16d   :  { %1578 = vmatprep.subr.mxu0 %v528_v39  ;;  %1649 = vmatprep.subr.mxu1 %v784_v40  ;;  %v671_v37 = vld [vmem:[%s4252_s1 + $0x1470] sm:$0xff]  ;;  %v664_v39 = vld [vmem:[%s4252_s1 + $0x1438] sm:$0xff] }
 0x16e   :  { %1579 = vmatpush2.msra.mxu0 %v527_v41  ;;  %1650 = vmatpush2.msra.mxu1 %v783_v42  ;;  %v407_v40 = vld [vmem:[%s4252_s1 + $0xc30] sm:$0xff]  ;;  %v1822_v42 = vld [vmem:[%s4253_s0 + $0x8] sm:$0xff] }
 0x16f   :  { %1580 = vmatprep.subr.mxu0 %v520_v0  ;;  %1651 = vmatprep.subr.mxu1 %v776_v43  ;;  %v663_v41 = vld [vmem:[%s4252_s1 + $0x1430] sm:$0xff]  ;;  %v902_v0 = vpop.f32.mrf.mxu0  ;;  %v973_v43 = vpop.f32.mrf.mxu1 }
 0x170   :  { %1581 = vmatpush2.msra.mxu0 %v519_v44  ;;  %1652 = vmatpush2.msra.mxu1 %v775_v1 }
 0x171   :  { %1582 = vmatprep.subr.mxu0 %v512_v45  ;;  %1653 = vmatprep.subr.mxu1 %v768_v46  ;;  %v904_v44 = vpop.f32.mrf.mxu0  ;;  %v975_v1 = vpop.f32.mrf.mxu1 }
 0x172   :  { %1583 = vmatpush2.msra.mxu0 %v511_v47  ;;  %1654 = vmatpush2.msra.mxu1 %v767_v48  ;;  %v787_v47 = vlaneseq }
 0x173   :  { %1584 = vmatprep.subr.mxu0 %v504_v49  ;;  %1655 = vmatprep.subr.mxu1 %v760_v50  ;;  %v1044_v45 = vpop.f32.mrf.mxu0  ;;  %v1115_v46 = vpop.f32.mrf.mxu1 }
 0x174   :  { %1585 = vmatpush2.msra.mxu0 %v503_v51  ;;  %1656 = vmatpush2.msra.mxu1 %v759_v52  ;;  %v4210_v50 = vshrl.u32 %v787_v47, 7 }
 0x175   :  { %1586 = vmatprep.subr.mxu0 %v496_v53  ;;  %1657 = vmatprep.subr.mxu1 %v752_v54  ;;  %v1046_v48 = vpop.f32.mrf.mxu0  ;;  %v1117_v49 = vpop.f32.mrf.mxu1 }
 0x176   :  { %1587 = vmatpush2.msra.mxu0 %v495_v55  ;;  %1658 = vmatpush2.msra.mxu1 %v751_v57  ;;  %v809_v52 = vsub.s32 5, %v4210_v50  ;;  %v793_v53 = vsub.s32 1, %v4210_v50  ;;  %v785_v55 = vld [vmem:[%s4254_s2] sm:$0xff]  ;;  %v805_v57 = vsub.s32 4, %v4210_v50  ;;  %vm1782_vm1 = vcmp.lt.s32.totalorder %v4210_v50, 4 }
 0x177   :  { %1588 = vmatprep.subr.mxu0 %v488_v58  ;;  %1659 = vmatprep.subr.mxu1 %v744_v59  ;;  %v789_v58 = vsub.s32 0, %v4210_v50  ;;  %v797_v59 = vsub.s32 2, %v4210_v50 }
 0x178   :  { %1589 = vmatpush2.msra.mxu0 %v487_v60  ;;  %1660 = vmatpush2.msra.mxu1 %v743_v61  ;;  %v801_v61 = vsub.s32 3, %v4210_v50 }
 0x179   :  { %1590 = vmatprep.subr.mxu0 %v480_v62  ;;  %1661 = vmatprep.subr.mxu1 %v736_v63  ;;  %v810_v62 = vrot.slane %v785_v55, %v809_v52  ;;  %v794_v63 = vrot.slane %v785_v55, %v793_v53 }
 0x17a   :  { %1591 = vmatpush2.msra.mxu0 %v479_v2  ;;  %1662 = vmatpush2.msra.mxu1 %v735_v4  ;;  %v806_v4 = vrot.slane %v785_v55, %v805_v57 }
 0x17b   :  { %1592 = vmatprep.subr.mxu0 %v472_v5  ;;  %1663 = vmatprep.subr.mxu1 %v728_v6  ;;  %v813_v5 = vsub.s32 6, %v4210_v50  ;;  %v790_v6 = vrot.slane %v785_v55, %v789_v58 }
 0x17c   :  { %1593 = vmatpush2.msra.mxu0 %v471_v7  ;;  %1664 = vmatpush2.msra.mxu1 %v727_v8  ;;  %v798_v7 = vrot.slane %v785_v55, %v797_v59 }
 0x17d   :  { %1594 = vmatprep.subr.mxu0 %v464_v10  ;;  %1665 = vmatprep.subr.mxu1 %v720_v11  ;;  %v802_v11 = vrot.slane %v785_v55, %v801_v61 }
 0x17e   :  { %1595 = vmatpush2.msra.mxu0 %v463_v12  ;;  %1666 = vmatpush2.msra.mxu1 %v719_v13  ;;  %v817_v13 = vsub.s32 7, %v4210_v50 }
 0x17f   :  { %1596 = vmatprep.subr.mxu0 %v456_v14  ;;  %1667 = vmatprep.subr.mxu1 %v712_v15  ;;  %v905_v14 = vadd.f32 %v904_v44, %v794_v63 }
 0x180   :  { %1597 = vmatpush2.msra.mxu0 %v455_v16  ;;  %1668 = vmatpush2.msra.mxu1 %v711_v17  ;;  %v814_v17 = vrot.slane %v785_v55, %v813_v5 }
 0x181   :  { %1598 = vmatprep.subr.mxu0 %v448_v18  ;;  %1669 = vmatprep.subr.mxu1 %v704_v19  ;;  %v903_v18 = vadd.f32 %v902_v0, %v790_v6  ;;  %v1116_v19 = vadd.f32 %v1115_v46, %v798_v7 }
 0x182   :  { %1599 = vmatpush2.msra.mxu0 %v447_v20  ;;  %1670 = vmatpush2.msra.mxu1 %v703_v21  ;;  %v1118_v21 = vadd.f32 %v1117_v49, %v802_v11 }
 0x183   :  { %1600 = vmatprep.subr.mxu0 %v440_v22  ;;  %1671 = vmatprep.subr.mxu1 %v696_v23  ;;  %v818_v23 = vrot.slane %v785_v55, %v817_v13 }
 0x184   :  { %1601 = vmatpush2.msra.mxu0 %v439_v24  ;;  %1672 = vmatpush2.msra.mxu1 %v695_v25  ;;  %v976_v24 = vadd.f32 %v975_v1, %v905_v14 }
 0x185   :  { %1602 = vmatprep.subr.mxu0 %v432_v26  ;;  %1673 = vmatprep.subr.mxu1 %v688_v27 }
 0x186   :  { %1603 = vmatpush2.msra.mxu0 %v431_v28  ;;  %1674 = vmatpush2.msra.mxu1 %v687_v29 }
 0x187   :  { %1604 = vmatprep.subr.mxu0 %v424_v30  ;;  %1675 = vmatprep.subr.mxu1 %v680_v31  ;;  %v974_v31 = vadd.f32 %v973_v43, %v903_v18 }
 0x188   :  { %1605 = vmatpush2.msra.mxu0 %v423_v32  ;;  %1676 = vmatpush2.msra.mxu1 %v679_v33 }
 0x189   :  { %1606 = vmatprep.subr.mxu0 %v416_v34  ;;  %1677 = vmatprep.subr.mxu1 %v672_v35  ;;  %v1047_v34 = vadd.f32 %v1046_v48, %v976_v24 }
 0x18a   :  { %1607 = vmatpush2.msra.mxu0 %v415_v36  ;;  %1678 = vmatpush2.msra.mxu1 %v671_v37 }
 0x18b   :  { %1608 = vmatprep.subr.mxu0 %v408_v38  ;;  %1679 = vmatprep.subr.mxu1 %v664_v39  ;;  %v1045_v38 = vadd.f32 %v1044_v45, %v974_v31  ;;  %v1690_v46 = vsel %vm1688_vm0, %v1047_v34, -inf }
 0x18c   :  { %1609 = vmatpush2.msra.mxu0 %v407_v40  ;;  %1610 = vmatprep.mubr.f32.mxu0 %v2239_v3  ;;  %v1186_v3 = vpop.f32.mrf.mxu0 }
 0x18d   :  { %1680 = vmatpush2.msra.mxu1 %v663_v41  ;;  %1681 = vmatprep.mubr.f32.mxu1 %v2629_v9  ;;  %v1257_v9 = vpop.f32.mrf.mxu1  ;;  %v1187_v25 = vadd.f32 %v1186_v3, %v1116_v19  ;;  %v1689_v3 = vsel %vm1688_vm0, %v1045_v38, -inf }
 0x18e   :  { %1611 = vmatmul.mubr.f32.vlgmr.msra.gmra.mxu0 %v1822_v42  ;;  %1682 = vmatmul.mubr.f32.vlgmr.msra.gmra.mxu1 %v3821_v56  ;;  %v1188_v51 = vpop.f32.mrf.mxu0 }
 0x18f   :  { %v1259_v54 = vpop.f32.mrf.mxu1  ;;  %v1189_v27 = vadd.f32 %v1188_v51, %v1118_v21  ;;  %v1258_v39 = vadd.f32 %v1257_v9, %v1187_v25 }
 0x191   :  { %v1260_v41 = vadd.f32 %v1259_v54, %v1189_v27  ;;  %v1691_v45 = vsel %vm1688_vm0, %v1258_v39, -inf }
 0x193   :  { %v1692_v9 = vsel %vm1688_vm0, %v1260_v41, -inf }
 0x1c9   :  { %v1328_v56 = vpop.f32.mrf.mxu0 }
 0x1ca   :  { %v1329_v16 = vadd.f32 %v1328_v56, %v806_v4 }
 0x1cb   :  { %v1399_v60 = vpop.f32.mrf.mxu1  ;;  %v1330_v2 = vpop.f32.mrf.mxu0 }
 0x1cc   :  { %v1331_v12 = vadd.f32 %v1330_v2, %v810_v62  ;;  %v1400_v28 = vadd.f32 %v1399_v60, %v1329_v16 }
 0x1cd   :  { %v1401_v8 = vpop.f32.mrf.mxu1 }
 0x1ce   :  { %v1402_v22 = vadd.f32 %v1401_v8, %v1331_v12 }
 0x20b   :  { %v1470_v10 = vpop.f32.mrf.mxu0 }
 0x20c   :  { %v1471_v35 = vadd.f32 %v1470_v10, %v1400_v28 }
 0x20d   :  { %v1541_v15 = vpop.f32.mrf.mxu1  ;;  %v1472_v20 = vpop.f32.mrf.mxu0 }
 0x20e   :  { %v1542_v29 = vadd.f32 %v1541_v15, %v814_v17  ;;  %v1473_v30 = vadd.f32 %v1472_v20, %v1402_v22  ;;  %v1693_v43 = vsel %vm1688_vm0, %v1471_v35, -inf }
 0x20f   :  { %v1543_v26 = vpop.f32.mrf.mxu1  ;;  %v1694_v52 = vmax.f32 %v1689_v3, %v1693_v43 }
 0x210   :  { %v1544_v36 = vadd.f32 %v1543_v26, %v818_v23  ;;  %v1695_v42 = vsel %vm1688_vm0, %v1473_v30, -inf }
 0x211   :  { %v1696_v49 = vmax.f32 %v1690_v46, %v1695_v42 }
 0x213   :  { %v1701_v56 = vmax.f32 %v1694_v52, %v1696_v49 }
 0x24e   :  { %v1612_v32 = vpop.f32.mrf.mxu0  ;;  %v1683_v33 = vpop.f32.mrf.mxu1 }
 0x24f   :  { %v1613_v37 = vadd.f32 %v1612_v32, %v1542_v29 }
 0x250   :  { %v1614_v40 = vpop.f32.mrf.mxu0  ;;  %v1685_v1 = vpop.f32.mrf.mxu1 }
 0x251   :  { %v1684_v0 = vadd.f32 %v1683_v33, %v1613_v37  ;;  %v1615_v44 = vadd.f32 %v1614_v40, %v1544_v36 }
 0x253   :  { %v1697_v47 = vsel %vm1688_vm0, %v1684_v0, -inf  ;;  %v1686_v48 = vadd.f32 %v1685_v1, %v1615_v44 }
 0x254   :  { %v1698_v53 = vmax.f32 %v1691_v45, %v1697_v47 }
 0x255   :  { %v1699_v51 = vsel %vm1688_vm0, %v1686_v48, -inf }
 0x256   :  { %v1700_v54 = vmax.f32 %v1692_v9, %v1699_v51 }
 0x258   :  { %v1702_v55 = vmax.f32 %v1698_v53, %v1700_v54 }
 0x25a   :  { %v1703_v57 = vmax.f32 %v1701_v56, %v1702_v55 }
 0x25c   :  { %1704 = vmax.xlane.f32.xlu0 %v1703_v57 }
 0x2e5   :  { %v1705_v58 = vpop.xlane.xlu0 %1704 }
 0x2e6   :  { %v1706_v59 = vsub.f32 %v1045_v38, %v1705_v58  ;;  %v1707_v60 = vsub.f32 %v1047_v34, %v1705_v58  ;;  %v1708_v61 = vsub.f32 %v1258_v39, %v1705_v58  ;;  %v1709_v62 = vsub.f32 %v1260_v41, %v1705_v58 }
 0x2e7   :  { %v1710_v63 = vsub.f32 %v1471_v35, %v1705_v58  ;;  %v1711_v2 = vsub.f32 %v1473_v30, %v1705_v58  ;;  %v1712_v7 = vsub.f32 %v1684_v0, %v1705_v58  ;;  %v1713_v11 = vsub.f32 %v1686_v48, %v1705_v58 }
 0x2e8   :  { %v1714_v4 = vmul.f32 1.442695, %v1706_v59  ;;  %v1716_v5 = vmul.f32 1.442695, %v1707_v60  ;;  %v1718_v6 = vmul.f32 1.442695, %v1708_v61 }
 0x2e9   :  { %v1720_v8 = vmul.f32 1.442695, %v1709_v62  ;;  %v1722_v10 = vmul.f32 1.442695, %v1710_v63  ;;  %v1724_v12 = vmul.f32 1.442695, %v1711_v2 }
 0x2ea   :  { %1799 = vpow2.f32 %v1714_v4  ;;  %v1726_v13 = vmul.f32 1.442695, %v1712_v7  ;;  %v1728_v14 = vmul.f32 1.442695, %v1713_v11 }
 0x2eb   :  { %1801 = vpow2.f32 %v1716_v5 }
 0x2ec   :  { %1803 = vpow2.f32 %v1718_v6 }
 0x2ed   :  { %1805 = vpow2.f32 %v1720_v8 }
 0x2ee   :  { %1807 = vpow2.f32 %v1722_v10 }
 0x2ef   :  { %1809 = vpow2.f32 %v1724_v12 }
 0x2f0   :  { %1811 = vpow2.f32 %v1726_v13 }
 0x2f1   :  { %1813 = vpow2.f32 %v1728_v14 }
 0x2f7   :  { %v1800_v15 = vpop.eup %1799 }
 0x2f8   :  { %v1802_v16 = vpop.eup %1801  ;;  %v1730_v17 = vsel %vm1688_vm0, %v1800_v15, 0.0  ;;  %v1747_v18 = vmul.f32 %v1800_v15, %v1706_v59 }
 0x2f9   :  { %v1804_v19 = vpop.eup %1803  ;;  %v1731_v20 = vsel %vm1688_vm0, %v1802_v16, 0.0  ;;  %v1748_v21 = vmul.f32 %v1802_v16, %v1707_v60 }
 0x2fa   :  { %v1806_v22 = vpop.eup %1805  ;;  %v1732_v23 = vadd.f32 %v1731_v20, %v1730_v17  ;;  %v1749_v24 = vmul.f32 %v1804_v19, %v1708_v61  ;;  %v1755_v25 = vsel %vm1688_vm0, %v1747_v18, 0.0  ;;  %v1733_v27 = vsel %vm1688_vm0, %v1804_v19, 0.0 }
 0x2fb   :  { %v1808_v26 = vpop.eup %1807  ;;  %v1750_v28 = vmul.f32 %v1806_v22, %v1709_v62  ;;  %v1756_v29 = vsel %vm1688_vm0, %v1748_v21, 0.0  ;;  %v1735_v33 = vsel %vm1688_vm0, %v1806_v22, 0.0 }
 0x2fc   :  { %v1810_v30 = vpop.eup %1809  ;;  %v1734_v31 = vadd.f32 %v1733_v27, %v1732_v23  ;;  %v1757_v32 = vadd.f32 %v1756_v29, %v1755_v25  ;;  %v1751_v34 = vmul.f32 %v1808_v26, %v1710_v63  ;;  %v1758_v35 = vsel %vm1688_vm0, %v1749_v24, 0.0 }
 0x2fd   :  { %v1812_v36 = vpop.eup %1811  ;;  %v1737_v39 = vsel %vm1688_vm0, %v1808_v26, 0.0  ;;  %v1752_v40 = vmul.f32 %v1810_v30, %v1711_v2  ;;  %v1760_v41 = vsel %vm1688_vm0, %v1750_v28, 0.0  ;;  %v1739_v1 = vsel %vm1688_vm0, %v1810_v30, 0.0 }
 0x2fe   :  { %v1736_v37 = vadd.f32 %v1735_v33, %v1734_v31  ;;  %v1759_v38 = vadd.f32 %v1758_v35, %v1757_v32  ;;  %v1814_v42 = vpop.eup %1813  ;;  %v1753_v46 = vmul.f32 %v1812_v36, %v1712_v7  ;;  %v1762_v43 = vsel %vm1688_vm0, %v1751_v34, 0.0 }
 0x2ff   :  { %v1741_v49 = vsel %vm1688_vm0, %v1812_v36, 0.0  ;;  %v1754_v3 = vmul.f32 %v1814_v42, %v1713_v11  ;;  %v1764_v45 = vsel %vm1688_vm0, %v1752_v40, 0.0  ;;  %v1743_v52 = vsel %vm1688_vm0, %v1814_v42, 0.0 }
 0x300   :  { %v1738_v0 = vadd.f32 %v1737_v39, %v1736_v37  ;;  %v1761_v44 = vadd.f32 %v1760_v41, %v1759_v38  ;;  %v1766_v53 = vsel %vm1688_vm0, %v1753_v46, 0.0 }
 0x301   :  { %v1768_v55 = vsel %vm1688_vm0, %v1754_v3, 0.0 }
 0x302   :  { %v1740_v47 = vadd.f32 %v1739_v1, %v1738_v0  ;;  %v1763_v48 = vadd.f32 %v1762_v43, %v1761_v44 }
 0x304   :  { %v1742_v9 = vadd.f32 %v1741_v49, %v1740_v47  ;;  %v1765_v51 = vadd.f32 %v1764_v45, %v1763_v48 }
 0x306   :  { %v1744_v54 = vadd.f32 %v1743_v52, %v1742_v9  ;;  %v1767_v56 = vadd.f32 %v1766_v53, %v1765_v51 }
 0x308   :  { %1745 = vadd.xlane.f32.xlu0 %v1744_v54  ;;  %v1769_v57 = vadd.f32 %v1768_v55, %v1767_v56 }
 0x30a   :  { %1770 = vadd.xlane.f32.xlu1 %v1769_v57 }
 0x391   :  { %v1746_v58 = vpop.xlane.xlu0 %1745 }
 0x392   :  { %1815 = vlog2.f32 %v1746_v58 }
 0x393   :  { %1817 = vrcp.f32 %v1746_v58  ;;  %v1771_v62 = vpop.xlane.xlu1 %1770 }
 0x39f   :  { %v1816_v59 = vpop.eup %1815 }
 0x3a0   :  { %v1818_v60 = vpop.eup %1817  ;;  %v1773_v61 = vmul.f32 0.6931472, %v1816_v59 }
 0x3a1   :  { %v1775_v63 = vmul.f32 %v1818_v60, %v1771_v62 }
 0x3a3   :  { %v1776_v2 = vsub.f32 %v1773_v61, %v1775_v63 }
 0x3a5   :  { %v1783_v4 = vsel %vm1782_vm1, %v1776_v2, 0.0 }
 0x3a6   :  { %v1784_v5 = vsel %vm1688_vm0, %v1783_v4, 0.0 }
 0x3a7   :  { %v1785_v6 = vrot.slane %v1784_v5, 4 }
 0x3a9   :  { %v1786_v7 = vadd.f32 %v1785_v6, %v1784_v5 }
 0x3ab   :  { %v1787_v8 = vrot.slane %v1786_v7, 2 }
 0x3ad   :  { %v1788_v10 = vadd.f32 %v1787_v8, %v1786_v7 }
 0x3af   :  { %v1789_v11 = vrot.slane %v1788_v10, 1 }
 0x3b1   :  { %v1790_v12 = vadd.f32 %v1789_v11, %v1788_v10 }
 0x3b3   :  { %1791 = vst [vmem:[%s4255_s3] sm:$0xff] %v1790_v12 }

</bundles_post_ra>
